<compile_context>
chip_gen: v7x
topology: tpu7x:2x2x1
jax: 0.10.0
libtpu: 0.0.40
codegen_flags: <defaults>
</compile_context>

<pallas_src>
import functools

import jax
import jax.numpy as jnp
from jax import lax
from jax.experimental import pallas as pl
from jax.experimental.pallas import tpu as pltpu


# ----------------------------- Pallas kernel --------------------------------


def _silu(x):
    return x * jax.nn.sigmoid(x)


def fused_hessian_kernel(
    # activations / helper matrices
    s_ref, v_ref, sel_ref, selT_ref, pswap_ref,
    # gated block 1 (sactivation = silu)
    wmv1_ref, wmw1_ref, w1s1_ref, w1v1_ref, b11_ref,
    w2s1_ref, b2s1_ref, w2g1_ref, b2g1_ref,
    # gated block 2 (no scalar activation; scalar output unused by the module)
    wmv2_ref, wmw2_ref, w1s2_ref, w1v2_ref, b12_ref,
    w2g2_ref, b2g2_ref,
    # output
    h_ref,
    *, n_mol, rows_per_mol,
):
    """Fused GatedEquivariantMLP (2 blocks) + per-molecule symmetrized Kronecker Hessians.

    s_ref  : (N, Sin)          scalar features
    v_ref  : (3N, Vin)         vector features, atom-major rows (row = atom*3 + xyz)
    sel    : (N, 3N)           0/1 matrix summing the 3 xyz rows of each atom
    selT   : (3N, N)           its transpose (broadcast per-atom gate to its 3 rows)
    pswap  : (F2, F2)          adjacent-pair-swap permutation scaled by 0.5*scalar
    h_ref  : (n_mol, 3n, 3n)   per-molecule Hessians
    """
    f32 = jnp.float32

    def mm(a, b):
        return jnp.dot(a, b, preferred_element_type=f32)

    sel = sel_ref[...]
    selT = selT_ref[...]

    # ---------------- gated equivariant block 1 (scalar activation = silu) ----------------
    v = v_ref[...]                                       # (3N, Vin)
    vpart = mm(v, wmv1_ref[...])                         # (3N, Vout)
    wpart = mm(v, wmw1_ref[...])                         # (3N, Vout)
    vn = jnp.sqrt(mm(sel, vpart * vpart))                # (N, Vout)  per-atom ||.|| over xyz
    h1 = _silu(mm(s_ref[...], w1s1_ref[...]) + mm(vn, w1v1_ref[...]) + b11_ref[...])
    s1 = _silu(mm(h1, w2s1_ref[...]) + b2s1_ref[...])    # scalar out of block 1 (silu)
    gate = mm(h1, w2g1_ref[...]) + b2g1_ref[...]         # (N, Vout)
    v1 = mm(selT, gate) * wpart                          # (3N, Vout)

    # ---------------- gated equivariant block 2 (scalar output discarded) -----------------
    vpart = mm(v1, wmv2_ref[...])                        # (3N, F2)
    wpart = mm(v1, wmw2_ref[...])                        # (3N, F2)
    vn = jnp.sqrt(mm(sel, vpart * vpart))                # (N, F2)
    h2 = _silu(mm(s1, w1s2_ref[...]) + mm(vn, w1v2_ref[...]) + b12_ref[...])
    gate = mm(h2, w2g2_ref[...]) + b2g2_ref[...]         # (N, F2)
    m = mm(selT, gate) * wpart                           # (3N, F2)  == l1_out rows (atom*3 + d)

    # ---------------- per-molecule symmetrized Kronecker sum ------------------------------
    # H_m = 0.5*scalar * M_m @ P @ M_m^T  ==  M_m @ (M_m @ pswap)^T   (symmetric by construction)
    msw = mm(m, pswap_ref[...])                          # pair-swapped channels, scaled
    dn = (((1,), (1,)), ((), ()))                        # contract channel axis of both operands
    for mol in range(n_mol):
        lo = mol * rows_per_mol
        hi = lo + rows_per_mol
        h_ref[mol] = lax.dot_general(m[lo:hi, :], msw[lo:hi, :], dn,
                                     preferred_element_type=f32)


# ----------------------------- wrapper ---------------------------------------


def hessian_kronecker_forward(l0, l1, params, *, n_mol, n_atom):
    """l0: (N_total, n_in) scalar rep; l1: (N_total, 3, n_in) vector rep."""
    n_total, n_in = l0.shape
    assert n_total == n_mol * n_atom
    rows = 3 * n_atom
    mid = params["block1"]["wmix"].shape[1] // 2
    f2 = params["block2"]["wmix"].shape[1] // 2
    assert f2 % 2 == 0, "F_2 must be even (channels are consumed in (even, odd) pairs)"

    # atom-major flatten of the vector rep: row = atom*3 + xyz (free reshape, no transpose)
    v3 = l1.reshape(3 * n_total, n_in)

    # 0/1 selection matrices: per-atom reduce over the 3 xyz rows, and broadcast back.
    grp = jnp.arange(3 * n_total, dtype=jnp.int32) // 3
    sel = (grp[None, :] == jnp.arange(n_total, dtype=jnp.int32)[:, None]).astype(jnp.float32)
    selT = sel.T

    # adjacent-channel pair-swap permutation with the learned 0.5*scalar folded in.
    perm = jnp.arange(f2) ^ 1
    pswap = (0.5 * params["scalar"][0, 0]) * jnp.eye(f2, dtype=jnp.float32)[perm]

    def split(p, n_sin, n_sout, n_vout, *, need_scalar_out):
        ops = [
            p["wmix"][:, :n_vout],        # wmix_v
            p["wmix"][:, n_vout:],        # wmix_w
            p["w1"][:n_sin, :],           # w1 rows that multiply the scalar features
            p["w1"][n_sin:, :],           # w1 rows that multiply the vector norms
            p["b1"],
        ]
        if need_scalar_out:
            ops += [p["w2"][:, :n_sout], p["b2"][:, :n_sout]]   # scalar head
        ops += [p["w2"][:, n_sout:], p["b2"][:, n_sout:]]       # gate head
        return ops

    ops1 = split(params["block1"], n_in, mid, mid, need_scalar_out=True)
    ops2 = split(params["block2"], mid, f2, f2, need_scalar_out=False)

    operands = [l0, v3, sel, selT, pswap] + ops1 + ops2
    vmem = pl.BlockSpec(memory_space=pltpu.MemorySpace.VMEM)

    kernel = functools.partial(fused_hessian_kernel, n_mol=n_mol, rows_per_mol=rows)
    h = pl.pallas_call(
        kernel,
        out_shape=jax.ShapeDtypeStruct((n_mol, rows, rows), jnp.float32),
        in_specs=[vmem] * len(operands),
        out_specs=vmem,
    )(*operands)
    # torch: torch.stack(hessians).view(-1, 27)
    return h.reshape(-1, 27)


# ----------------------------- pure-JAX reference ---------------------------


def _ref_block(s, v, p, sact):
    n_vout = p["wmix"].shape[1] // 2
    n_sout = p["w2"].shape[1] - n_vout
    vmix = jnp.einsum("ndi,io->ndo", v, p["wmix"])
    v_part, w_part = vmix[..., :n_vout], vmix[..., n_vout:]
    vn = jnp.sqrt(jnp.sum(v_part * v_part, axis=-2))
    ctx = jnp.concatenate([s, vn], axis=-1)
    h = jax.nn.silu(ctx @ p["w1"] + p["b1"])
    x = h @ p["w2"] + p["b2"]
    s_out, gate = x[:, :n_sout], x[:, n_sout:]
    v_out = gate[:, None, :] * w_part
    if sact:
        s_out = jax.nn.silu(s_out)
    return s_out, v_out


def reference_forward(l0, l1, params, *, n_mol, n_atom):
    s, v = _ref_block(l0, l1, params["block1"], True)
    s, v = _ref_block(s, v, params["block2"], False)
    scalar = params["scalar"][0, 0]
    hessians = []
    for b in range(n_mol):
        la = v[b * n_atom:(b + 1) * n_atom]                       # (n_atom, 3, F_2)
        acc = jnp.zeros((n_atom * 3, n_atom * 3), jnp.float32)
        for i in range(0, la.shape[-1], 2):
            a = la[:, :, i].reshape(-1)
            c = la[:, :, i + 1].reshape(-1)
            acc = acc + scalar * jnp.outer(a, c)
        acc = (acc + acc.T) / 2.0
        hessians.append(acc)
    return jnp.stack(hessians, axis=0).reshape(-1, 27)


# ----------------------------- param init -----------------------------------


def init_params(key, n_in, f2):
    # build_gated_equivariant_mlp(n_hidden=None, n_layers=2):
    #   n_neurons = [n_in, max(f2, n_in // 2), f2]; gating hidden = [n_in, mid]
    mid = max(f2, n_in // 2)

    def dense(key, fan_in, fan_out, bias=True):
        k1, _ = jax.random.split(key)
        w = 0.1 * jax.random.normal(k1, (fan_in, fan_out), jnp.float32)
        b = jnp.zeros((1, fan_out), jnp.float32) if bias else None
        return w, b

    keys = jax.random.split(key, 6)
    # block 1: n_sin=n_vin=n_in, n_sout=n_vout=mid, n_hidden=n_in, sactivation=silu
    wmix1, _ = dense(keys[0], n_in, 2 * mid, bias=False)
    w1_1, b1_1 = dense(keys[1], n_in + mid, n_in)
    w2_1, b2_1 = dense(keys[2], n_in, mid + mid)
    # block 2: n_sin=n_vin=mid, n_sout=n_vout=f2, n_hidden=mid, sactivation=None
    wmix2, _ = dense(keys[3], mid, 2 * f2, bias=False)
    w1_2, b1_2 = dense(keys[4], mid + f2, mid)
    w2_2, b2_2 = dense(keys[5], mid, f2 + f2)
    return {
        "block1": {"wmix": wmix1, "w1": w1_1, "b1": b1_1, "w2": w2_1, "b2": b2_1},
        "block2": {"wmix": wmix2, "w1": w1_2, "b1": b1_2, "w2": w2_2, "b2": b2_2},
        "scalar": jnp.full((1, 1), 100.0, jnp.float32),   # nn.Parameter(torch.tensor(100.0))
    }


# ----------------------------- main ------------------------------------------


if __name__ == "__main__":
    n_in = 32
    F_2 = 20
    n_mol = 2
    n_atom = 9                      # 3*n_atom = 27  ->  matches the module's .view(-1, 27)
    n_total = n_mol * n_atom

    key = jax.random.PRNGKey(0)
    k_par, k_l0, k_l1, k_pos = jax.random.split(key, 4)
    params = init_params(k_par, n_in, F_2)

    l0 = jax.random.normal(k_l0, (n_total, n_in), jnp.float32)           # scalar_representation
    l1 = 0.5 * jax.random.normal(k_l1, (n_total, 3, n_in), jnp.float32)  # vector_representation
    positions = jax.random.normal(k_pos, (n_total, 3), jnp.float32)      # read but unused by forward
    del positions

    fwd = jax.jit(functools.partial(hessian_kronecker_forward, n_mol=n_mol, n_atom=n_atom))
    out = fwd(l0, l1, params)
    out = jax.block_until_ready(out)

    ref = reference_forward(l0, l1, params, n_mol=n_mol, n_atom=n_atom)
    assert out.shape == (n_mol * 27, 27), out.shape
    assert jnp.allclose(out, ref, rtol=1e-4, atol=1e-4), float(jnp.max(jnp.abs(out - ref)))

    print("KERNEL_OK")
</pallas_src>

<mosaic_0001>
module attributes {stable_mosaic.version = 11 : i64} {
  func.func @fused_hessian_kernel(%arg0: memref<18x32xf32, #tpu.memory_space<vmem>>, %arg1: memref<54x32xf32, #tpu.memory_space<vmem>>, %arg2: memref<18x54xf32, #tpu.memory_space<vmem>>, %arg3: memref<54x18xf32, #tpu.memory_space<vmem>>, %arg4: memref<20x20xf32, #tpu.memory_space<vmem>>, %arg5: memref<32x20xf32, #tpu.memory_space<vmem>>, %arg6: memref<32x20xf32, #tpu.memory_space<vmem>>, %arg7: memref<32x32xf32, #tpu.memory_space<vmem>>, %arg8: memref<20x32xf32, #tpu.memory_space<vmem>>, %arg9: memref<1x32xf32, #tpu.memory_space<vmem>>, %arg10: memref<32x20xf32, #tpu.memory_space<vmem>>, %arg11: memref<1x20xf32, #tpu.memory_space<vmem>>, %arg12: memref<32x20xf32, #tpu.memory_space<vmem>>, %arg13: memref<1x20xf32, #tpu.memory_space<vmem>>, %arg14: memref<20x20xf32, #tpu.memory_space<vmem>>, %arg15: memref<20x20xf32, #tpu.memory_space<vmem>>, %arg16: memref<20x20xf32, #tpu.memory_space<vmem>>, %arg17: memref<20x20xf32, #tpu.memory_space<vmem>>, %arg18: memref<1x20xf32, #tpu.memory_space<vmem>>, %arg19: memref<20x20xf32, #tpu.memory_space<vmem>>, %arg20: memref<1x20xf32, #tpu.memory_space<vmem>>, %arg21: memref<2x27x27xf32, #tpu.memory_space<vmem>>) attributes {dimension_semantics = [], scalar_prefetch = 0 : i64, scratch_operands = 0 : i64, tpu.core_type = #tpu.core_type<tc>} {
    %c0 = arith.constant 0 : index
    %c0_0 = arith.constant 0 : index
    %0 = vector.load %arg2[%c0, %c0_0] : memref<18x54xf32, #tpu.memory_space<vmem>>, vector<18x54xf32>
    %c0_1 = arith.constant 0 : index
    %c0_2 = arith.constant 0 : index
    %1 = vector.load %arg3[%c0_1, %c0_2] : memref<54x18xf32, #tpu.memory_space<vmem>>, vector<54x18xf32>
    %c0_3 = arith.constant 0 : index
    %c0_4 = arith.constant 0 : index
    %2 = vector.load %arg1[%c0_3, %c0_4] : memref<54x32xf32, #tpu.memory_space<vmem>>, vector<54x32xf32>
    %c0_5 = arith.constant 0 : index
    %c0_6 = arith.constant 0 : index
    %3 = vector.load %arg5[%c0_5, %c0_6] : memref<32x20xf32, #tpu.memory_space<vmem>>, vector<32x20xf32>
    %cst = arith.constant dense<0.000000e+00> : vector<54x20xf32>
    %4 = tpu.matmul %2, %3, %cst {dimension_numbers = #tpu.dot_dimension_numbers<[1], [0], [0], [1], [0, 0, 1, 1], [], []>} : vector<54x32xf32>, vector<32x20xf32>, vector<54x20xf32> -> vector<54x20xf32>
    %c0_7 = arith.constant 0 : index
    %c0_8 = arith.constant 0 : index
    %5 = vector.load %arg6[%c0_7, %c0_8] : memref<32x20xf32, #tpu.memory_space<vmem>>, vector<32x20xf32>
    %cst_9 = arith.constant dense<0.000000e+00> : vector<54x20xf32>
    %6 = tpu.matmul %2, %5, %cst_9 {dimension_numbers = #tpu.dot_dimension_numbers<[1], [0], [0], [1], [0, 0, 1, 1], [], []>} : vector<54x32xf32>, vector<32x20xf32>, vector<54x20xf32> -> vector<54x20xf32>
    %7 = arith.mulf %4, %4 : vector<54x20xf32>
    %cst_10 = arith.constant dense<0.000000e+00> : vector<18x20xf32>
    %8 = tpu.matmul %0, %7, %cst_10 {dimension_numbers = #tpu.dot_dimension_numbers<[1], [0], [0], [1], [0, 0, 1, 1], [], []>} : vector<18x54xf32>, vector<54x20xf32>, vector<18x20xf32> -> vector<18x20xf32>
    %9 = math.sqrt %8 : vector<18x20xf32>
    %c0_11 = arith.constant 0 : index
    %c0_12 = arith.constant 0 : index
    %10 = vector.load %arg0[%c0_11, %c0_12] : memref<18x32xf32, #tpu.memory_space<vmem>>, vector<18x32xf32>
    %c0_13 = arith.constant 0 : index
    %c0_14 = arith.constant 0 : index
    %11 = vector.load %arg7[%c0_13, %c0_14] : memref<32x32xf32, #tpu.memory_space<vmem>>, vector<32x32xf32>
    %cst_15 = arith.constant dense<0.000000e+00> : vector<18x32xf32>
    %12 = tpu.matmul %10, %11, %cst_15 {dimension_numbers = #tpu.dot_dimension_numbers<[1], [0], [0], [1], [0, 0, 1, 1], [], []>} : vector<18x32xf32>, vector<32x32xf32>, vector<18x32xf32> -> vector<18x32xf32>
    %c0_16 = arith.constant 0 : index
    %c0_17 = arith.constant 0 : index
    %13 = vector.load %arg8[%c0_16, %c0_17] : memref<20x32xf32, #tpu.memory_space<vmem>>, vector<20x32xf32>
    %cst_18 = arith.constant dense<0.000000e+00> : vector<18x32xf32>
    %14 = tpu.matmul %9, %13, %cst_18 {dimension_numbers = #tpu.dot_dimension_numbers<[1], [0], [0], [1], [0, 0, 1, 1], [], []>} : vector<18x20xf32>, vector<20x32xf32>, vector<18x32xf32> -> vector<18x32xf32>
    %15 = arith.addf %12, %14 : vector<18x32xf32>
    %c0_19 = arith.constant 0 : index
    %c0_20 = arith.constant 0 : index
    %16 = vector.load %arg9[%c0_19, %c0_20] : memref<1x32xf32, #tpu.memory_space<vmem>>, vector<1x32xf32>
    %17 = vector.broadcast %16 : vector<1x32xf32> to vector<18x32xf32>
    %18 = arith.addf %15, %17 : vector<18x32xf32>
    %19 = arith.negf %18 : vector<18x32xf32>
    %20 = math.exp %19 : vector<18x32xf32>
    %cst_21 = arith.constant 1.000000e+00 : f32
    %21 = vector.broadcast %cst_21 : f32 to vector<18x32xf32>
    %22 = arith.addf %21, %20 : vector<18x32xf32>
    %23 = arith.divf %21, %22 : vector<18x32xf32>
    %24 = arith.mulf %18, %23 : vector<18x32xf32>
    %c0_22 = arith.constant 0 : index
    %c0_23 = arith.constant 0 : index
    %25 = vector.load %arg10[%c0_22, %c0_23] : memref<32x20xf32, #tpu.memory_space<vmem>>, vector<32x20xf32>
    %cst_24 = arith.constant dense<0.000000e+00> : vector<18x20xf32>
    %26 = tpu.matmul %24, %25, %cst_24 {dimension_numbers = #tpu.dot_dimension_numbers<[1], [0], [0], [1], [0, 0, 1, 1], [], []>} : vector<18x32xf32>, vector<32x20xf32>, vector<18x20xf32> -> vector<18x20xf32>
    %c0_25 = arith.constant 0 : index
    %c0_26 = arith.constant 0 : index
    %27 = vector.load %arg11[%c0_25, %c0_26] : memref<1x20xf32, #tpu.memory_space<vmem>>, vector<1x20xf32>
    %28 = vector.broadcast %27 : vector<1x20xf32> to vector<18x20xf32>
    %29 = arith.addf %26, %28 : vector<18x20xf32>
    %30 = arith.negf %29 : vector<18x20xf32>
    %31 = math.exp %30 : vector<18x20xf32>
    %cst_27 = arith.constant 1.000000e+00 : f32
    %32 = vector.broadcast %cst_27 : f32 to vector<18x20xf32>
    %33 = arith.addf %32, %31 : vector<18x20xf32>
    %34 = arith.divf %32, %33 : vector<18x20xf32>
    %35 = arith.mulf %29, %34 : vector<18x20xf32>
    %c0_28 = arith.constant 0 : index
    %c0_29 = arith.constant 0 : index
    %36 = vector.load %arg12[%c0_28, %c0_29] : memref<32x20xf32, #tpu.memory_space<vmem>>, vector<32x20xf32>
    %cst_30 = arith.constant dense<0.000000e+00> : vector<18x20xf32>
    %37 = tpu.matmul %24, %36, %cst_30 {dimension_numbers = #tpu.dot_dimension_numbers<[1], [0], [0], [1], [0, 0, 1, 1], [], []>} : vector<18x32xf32>, vector<32x20xf32>, vector<18x20xf32> -> vector<18x20xf32>
    %c0_31 = arith.constant 0 : index
    %c0_32 = arith.constant 0 : index
    %38 = vector.load %arg13[%c0_31, %c0_32] : memref<1x20xf32, #tpu.memory_space<vmem>>, vector<1x20xf32>
    %39 = vector.broadcast %38 : vector<1x20xf32> to vector<18x20xf32>
    %40 = arith.addf %37, %39 : vector<18x20xf32>
    %cst_33 = arith.constant dense<0.000000e+00> : vector<54x20xf32>
    %41 = tpu.matmul %1, %40, %cst_33 {dimension_numbers = #tpu.dot_dimension_numbers<[1], [0], [0], [1], [0, 0, 1, 1], [], []>} : vector<54x18xf32>, vector<18x20xf32>, vector<54x20xf32> -> vector<54x20xf32>
    %42 = arith.mulf %41, %6 : vector<54x20xf32>
    %c0_34 = arith.constant 0 : index
    %c0_35 = arith.constant 0 : index
    %43 = vector.load %arg14[%c0_34, %c0_35] : memref<20x20xf32, #tpu.memory_space<vmem>>, vector<20x20xf32>
    %cst_36 = arith.constant dense<0.000000e+00> : vector<54x20xf32>
    %44 = tpu.matmul %42, %43, %cst_36 {dimension_numbers = #tpu.dot_dimension_numbers<[1], [0], [0], [1], [0, 0, 1, 1], [], []>} : vector<54x20xf32>, vector<20x20xf32>, vector<54x20xf32> -> vector<54x20xf32>
    %c0_37 = arith.constant 0 : index
    %c0_38 = arith.constant 0 : index
    %45 = vector.load %arg15[%c0_37, %c0_38] : memref<20x20xf32, #tpu.memory_space<vmem>>, vector<20x20xf32>
    %cst_39 = arith.constant dense<0.000000e+00> : vector<54x20xf32>
    %46 = tpu.matmul %42, %45, %cst_39 {dimension_numbers = #tpu.dot_dimension_numbers<[1], [0], [0], [1], [0, 0, 1, 1], [], []>} : vector<54x20xf32>, vector<20x20xf32>, vector<54x20xf32> -> vector<54x20xf32>
    %47 = arith.mulf %44, %44 : vector<54x20xf32>
    %cst_40 = arith.constant dense<0.000000e+00> : vector<18x20xf32>
    %48 = tpu.matmul %0, %47, %cst_40 {dimension_numbers = #tpu.dot_dimension_numbers<[1], [0], [0], [1], [0, 0, 1, 1], [], []>} : vector<18x54xf32>, vector<54x20xf32>, vector<18x20xf32> -> vector<18x20xf32>
    %49 = math.sqrt %48 : vector<18x20xf32>
    %c0_41 = arith.constant 0 : index
    %c0_42 = arith.constant 0 : index
    %50 = vector.load %arg16[%c0_41, %c0_42] : memref<20x20xf32, #tpu.memory_space<vmem>>, vector<20x20xf32>
    %cst_43 = arith.constant dense<0.000000e+00> : vector<18x20xf32>
    %51 = tpu.matmul %35, %50, %cst_43 {dimension_numbers = #tpu.dot_dimension_numbers<[1], [0], [0], [1], [0, 0, 1, 1], [], []>} : vector<18x20xf32>, vector<20x20xf32>, vector<18x20xf32> -> vector<18x20xf32>
    %c0_44 = arith.constant 0 : index
    %c0_45 = arith.constant 0 : index
    %52 = vector.load %arg17[%c0_44, %c0_45] : memref<20x20xf32, #tpu.memory_space<vmem>>, vector<20x20xf32>
    %cst_46 = arith.constant dense<0.000000e+00> : vector<18x20xf32>
    %53 = tpu.matmul %49, %52, %cst_46 {dimension_numbers = #tpu.dot_dimension_numbers<[1], [0], [0], [1], [0, 0, 1, 1], [], []>} : vector<18x20xf32>, vector<20x20xf32>, vector<18x20xf32> -> vector<18x20xf32>
    %54 = arith.addf %51, %53 : vector<18x20xf32>
    %c0_47 = arith.constant 0 : index
    %c0_48 = arith.constant 0 : index
    %55 = vector.load %arg18[%c0_47, %c0_48] : memref<1x20xf32, #tpu.memory_space<vmem>>, vector<1x20xf32>
    %56 = vector.broadcast %55 : vector<1x20xf32> to vector<18x20xf32>
    %57 = arith.addf %54, %56 : vector<18x20xf32>
    %58 = arith.negf %57 : vector<18x20xf32>
    %59 = math.exp %58 : vector<18x20xf32>
    %cst_49 = arith.constant 1.000000e+00 : f32
    %60 = vector.broadcast %cst_49 : f32 to vector<18x20xf32>
    %61 = arith.addf %60, %59 : vector<18x20xf32>
    %62 = arith.divf %60, %61 : vector<18x20xf32>
    %63 = arith.mulf %57, %62 : vector<18x20xf32>
    %c0_50 = arith.constant 0 : index
    %c0_51 = arith.constant 0 : index
    %64 = vector.load %arg19[%c0_50, %c0_51] : memref<20x20xf32, #tpu.memory_space<vmem>>, vector<20x20xf32>
    %cst_52 = arith.constant dense<0.000000e+00> : vector<18x20xf32>
    %65 = tpu.matmul %63, %64, %cst_52 {dimension_numbers = #tpu.dot_dimension_numbers<[1], [0], [0], [1], [0, 0, 1, 1], [], []>} : vector<18x20xf32>, vector<20x20xf32>, vector<18x20xf32> -> vector<18x20xf32>
    %c0_53 = arith.constant 0 : index
    %c0_54 = arith.constant 0 : index
    %66 = vector.load %arg20[%c0_53, %c0_54] : memref<1x20xf32, #tpu.memory_space<vmem>>, vector<1x20xf32>
    %67 = vector.broadcast %66 : vector<1x20xf32> to vector<18x20xf32>
    %68 = arith.addf %65, %67 : vector<18x20xf32>
    %cst_55 = arith.constant dense<0.000000e+00> : vector<54x20xf32>
    %69 = tpu.matmul %1, %68, %cst_55 {dimension_numbers = #tpu.dot_dimension_numbers<[1], [0], [0], [1], [0, 0, 1, 1], [], []>} : vector<54x18xf32>, vector<18x20xf32>, vector<54x20xf32> -> vector<54x20xf32>
    %70 = arith.mulf %69, %46 : vector<54x20xf32>
    %c0_56 = arith.constant 0 : index
    %c0_57 = arith.constant 0 : index
    %71 = vector.load %arg4[%c0_56, %c0_57] : memref<20x20xf32, #tpu.memory_space<vmem>>, vector<20x20xf32>
    %cst_58 = arith.constant dense<0.000000e+00> : vector<54x20xf32>
    %72 = tpu.matmul %70, %71, %cst_58 {dimension_numbers = #tpu.dot_dimension_numbers<[1], [0], [0], [1], [0, 0, 1, 1], [], []>} : vector<54x20xf32>, vector<20x20xf32>, vector<54x20xf32> -> vector<54x20xf32>
    %73 = vector.extract_strided_slice %70 {offsets = [0, 0], sizes = [27, 20], strides = [1, 1]} : vector<54x20xf32> to vector<27x20xf32>
    %74 = vector.extract_strided_slice %72 {offsets = [0, 0], sizes = [27, 20], strides = [1, 1]} : vector<54x20xf32> to vector<27x20xf32>
    %cst_59 = arith.constant dense<0.000000e+00> : vector<27x27xf32>
    %75 = tpu.matmul %73, %74, %cst_59 {dimension_numbers = #tpu.dot_dimension_numbers<[1], [1], [0], [0], [0, 0, 1, 0], [], []>} : vector<27x20xf32>, vector<27x20xf32>, vector<27x27xf32> -> vector<27x27xf32>
    %c0_60 = arith.constant 0 : index
    %c0_61 = arith.constant 0 : index
    %c0_62 = arith.constant 0 : index
    %76 = vector.load %arg21[%c0_60, %c0_61, %c0_62] : memref<2x27x27xf32, #tpu.memory_space<vmem>>, vector<1x27x27xf32>
    %77 = vector.shape_cast %76 : vector<1x27x27xf32> to vector<27x27xf32>
    %78 = vector.shape_cast %75 : vector<27x27xf32> to vector<1x27x27xf32>
    tpu.vector_store %arg21[%c0_60, %c0_61, %c0_62], %78 {strides = array<i32>} : memref<2x27x27xf32, #tpu.memory_space<vmem>>, vector<1x27x27xf32>,
    %79 = vector.extract_strided_slice %70 {offsets = [27, 0], sizes = [27, 20], strides = [1, 1]} : vector<54x20xf32> to vector<27x20xf32>
    %80 = vector.extract_strided_slice %72 {offsets = [27, 0], sizes = [27, 20], strides = [1, 1]} : vector<54x20xf32> to vector<27x20xf32>
    %cst_63 = arith.constant dense<0.000000e+00> : vector<27x27xf32>
    %81 = tpu.matmul %79, %80, %cst_63 {dimension_numbers = #tpu.dot_dimension_numbers<[1], [1], [0], [0], [0, 0, 1, 0], [], []>} : vector<27x20xf32>, vector<27x20xf32>, vector<27x27xf32> -> vector<27x27xf32>
    %c1 = arith.constant 1 : index
    %c0_64 = arith.constant 0 : index
    %c0_65 = arith.constant 0 : index
    %82 = vector.load %arg21[%c1, %c0_64, %c0_65] : memref<2x27x27xf32, #tpu.memory_space<vmem>>, vector<1x27x27xf32>
    %83 = vector.shape_cast %82 : vector<1x27x27xf32> to vector<27x27xf32>
    %84 = vector.shape_cast %81 : vector<27x27xf32> to vector<1x27x27xf32>
    tpu.vector_store %arg21[%c1, %c0_64, %c0_65], %84 {strides = array<i32>} : memref<2x27x27xf32, #tpu.memory_space<vmem>>, vector<1x27x27xf32>,
    return
  }
}

</mosaic_0001>

<bundles_post_ra>
// kernel: hessian_kronecker_forward.1
= control target key start
LH: loop header
LB: loop body
LE: loop exit
PB: predicated region body
PF: predicated region fallthrough
CT: control target
= control target key end

     0   :  { %v2951_v0 = vmov 0.0|0.0   ;;  %vm2952_vm0 = vmmov 0   ;;  %v2953_v4 = vmov 0.0   ;;  %vm89_vm1 = vcmask 261120   ;;  %s3711_s5 = inlined_call_operand.vmem [shape: f32[32,20], index: 5, kind: input, shape index: {}]   ;;  %s3712_s6 = inlined_call_operand.vmem [shape: f32[32,20], index: 6, kind: input, shape index: {}]   ;;  %s3713_s1 = inlined_call_operand.vmem [shape: f32[54,32], index: 1, kind: input, shape index: {}]   ;;  %s3714_s2 = inlined_call_operand.vmem [shape: f32[18,54], index: 2, kind: input, shape index: {}]   ;;  %s3715_s7 = inlined_call_operand.vmem [shape: f32[32,32], index: 7, kind: input, shape index: {}]   ;;  %s3716_s8 = inlined_call_operand.vmem [shape: f32[20,32], index: 8, kind: input, shape index: {}]   ;;  %s3717_s0 = inlined_call_operand.vmem [shape: f32[18,32], index: 0, kind: input, shape index: {}]   ;;  %s3718_s10 = inlined_call_operand.vmem [shape: f32[32,20], index: 10, kind: input, shape index: {}]   ;;  %s3719_s12 = inlined_call_operand.vmem [shape: f32[32,20], index: 12, kind: input, shape index: {}]   ;;  %s3720_s9 = inlined_call_operand.vmem [shape: f32[1,32], index: 9, kind: input, shape index: {}]   ;;  %s3721_s14 = inlined_call_operand.vmem [shape: f32[20,20], index: 14, kind: input, shape index: {}]   ;;  %s3722_s13 = inlined_call_operand.vmem [shape: f32[1,20], index: 13, kind: input, shape index: {}]   ;;  %s3723_s15 = inlined_call_operand.vmem [shape: f32[20,20], index: 15, kind: input, shape index: {}]   ;;  %s3724_s3 = inlined_call_operand.vmem [shape: f32[54,18], index: 3, kind: input, shape index: {}]   ;;  %s3725_s11 = inlined_call_operand.vmem [shape: f32[1,20], index: 11, kind: input, shape index: {}]   ;;  %s3726_s16 = inlined_call_operand.vmem [shape: f32[20,20], index: 16, kind: input, shape index: {}]   ;;  %s3727_s17 = inlined_call_operand.vmem [shape: f32[20,20], index: 17, kind: input, shape index: {}]   ;;  %s3728_s19 = inlined_call_operand.vmem [shape: f32[20,20], index: 19, kind: input, shape index: {}]   ;;  %s3729_s18 = inlined_call_operand.vmem [shape: f32[1,20], index: 18, kind: input, shape index: {}]   ;;  %s3730_s4 = inlined_call_operand.vmem [shape: f32[20,20], index: 4, kind: input, shape index: {}]   ;;  %s3731_s20 = inlined_call_operand.vmem [shape: f32[1,20], index: 20, kind: input, shape index: {}]   ;;  %s3732_s21 = inlined_call_operand.vmem [shape: f32[2,27,27], index: 21, kind: output, shape index: {}]  }
   0x1   :  { %3739 = sst [smem:[#allocation2_spill]] %s3711_s5  ;;  %2793 = vmatprep.subr.bf16.mxu0 %v2951_v0  ;;  %2423 = vmatprep.mubr.msk.f32.mxu0 %vm2952_vm0, %v2953_v4  ;;  %vm332_vm2 = vcmask 1045504   ;;  %vm322_vm3 = vcmask 441344   ;;  %vm457_vm4 = vcmask 1043456   ;;  %vm447_vm6 = vcmask 162816  }
   0x2   :  { %3740 = sst [smem:[#allocation3_spill]] %s3712_s6  ;;  %s3745_s26 = sld [smem:[#allocation2_spill]]  ;;  %2799 = vmatprep.subr.bf16.mxu1 %v2951_v0  ;;  %2452 = vmatprep.mubr.msk.f32.mxu1 %vm2952_vm0, %v2953_v4  ;;  %vm895_vm12 = vcmask 1041408   ;;  %vm873_vm13 = vcmask 146432  }
   0x3   :  { %3741 = sst [smem:[#allocation4_spill]] %s3713_s1  ;;  %s3746_s22 = sld [smem:[#allocation3_spill]] }
   0x4   :  { %3742 = sst [smem:[#allocation5_spill]] %s3714_s2  ;;  %s3747_s28 = sld [smem:[#allocation4_spill]] }
   0x5   :  { %3743 = sst [smem:[#allocation6_spill]] %s3715_s7 }
   0x6   :  { %3744 = sst [smem:[#allocation7_spill]] %s3716_s8  ;;  %s3749_s23 = sld [smem:[#allocation6_spill]] }
   0x8   :  { %v85_v1 = vld [vmem:[%s3745_s26] sm:$0xff]  ;;  %v86_v2 = vld [vmem:[%s3745_s26 + $0x8] sm:$0xff]  ;;  %v87_v3 = vld [vmem:[%s3745_s26 + $0x10] sm:$0xff] }
   0x9   :  { %v2794_v5 = vpack.c.bf16 %v86_v2, %v85_v1  ;;  %v88_v6 = vld [vmem:[%s3745_s26 + $0x18] sm:$0xff]  ;;  %v211_v8 = vld [vmem:[%s3746_s22] sm:$0xff]  ;;  %v212_v9 = vld [vmem:[%s3746_s22 + $0x8] sm:$0xff]  ;;  %s3750_s26 = sld [smem:[#allocation7_spill]] }
   0xa   :  { %v2797_v7 = vpack.c.bf16 %v88_v6, %v87_v3  ;;  %v213_v10 = vld [vmem:[%s3746_s22 + $0x10] sm:$0xff]  ;;  %v214_v11 = vld [vmem:[%s3746_s22 + $0x18] sm:$0xff]  ;;  %v2800_v12 = vpack.c.bf16 %v212_v9, %v211_v8  ;;  %v78_v13 = vld [vmem:[%s3747_s28] sm:$0xff] }
   0xb   :  { %2795 = vmatpush3.bf16.msra.mxu0 %v2794_v5  ;;  %v2803_v14 = vpack.c.bf16 %v214_v11, %v213_v10  ;;  %v79_v15 = vld [vmem:[%s3747_s28 + $0x8] sm:$0xff]  ;;  %v80_v16 = vld [vmem:[%s3747_s28 + $0x10] sm:$0xff]  ;;  %v81_v17 = vld [vmem:[%s3747_s28 + $0x18] sm:$0xff] }
   0xc   :  { %2796 = vmatprep.subr.bf16.mxu0 %v2951_v0  ;;  %2801 = vmatpush3.bf16.msra.mxu1 %v2800_v12  ;;  %v82_v18 = vld [vmem:[%s3747_s28 + $0x20] sm:$0xff]  ;;  %v83_v19 = vld [vmem:[%s3747_s28 + $0x28] sm:$0xff]  ;;  %v84_v20 = vld [vmem:[%s3747_s28 + $0x30] sm:$0x3f]  ;;  %s3748_s28 = sld [smem:[#allocation5_spill]] }
   0xd   :  { %2802 = vmatprep.subr.bf16.mxu1 %v2951_v0  ;;  %v440_v62 = vld [vmem:[%s3749_s23] sm:$0xff]  ;;  %v441_v63 = vld [vmem:[%s3749_s23 + $0x8] sm:$0xff]  ;;  %v442_v6 = vld [vmem:[%s3749_s23 + $0x10] sm:$0xff] }
   0xe   :  { %v2818_v1 = vpack.c.bf16 %v441_v63, %v440_v62  ;;  %v437_v10 = vld [vmem:[%s3717_s0] sm:$0xff]  ;;  %v438_v11 = vld [vmem:[%s3717_s0 + $0x8] sm:$0xff]  ;;  %v439_v12 = vld [vmem:[%s3717_s0 + $0x10] sm:$0x3] }
   0xf   :  { %2798 = vmatpush3.bf16.msra.mxu0 %v2797_v7  ;;  %v444_v2 = vld [vmem:[%s3750_s26] sm:$0xff]  ;;  %v445_v3 = vld [vmem:[%s3750_s26 + $0x8] sm:$0xff]  ;;  %v443_v7 = vld [vmem:[%s3749_s23 + $0x18] sm:$0xff] }
  0x10   :  { %2805 = vmatprep.subr.bf16.mxu0 %v2951_v0  ;;  %2804 = vmatpush3.bf16.msra.mxu1 %v2803_v14  ;;  %v2815_v5 = vpack.c.bf16 %v445_v3, %v444_v2  ;;  %v2821_v8 = vpack.c.bf16 %v443_v7, %v442_v6  ;;  %v446_v9 = vld [vmem:[%s3750_s26 + $0x10] sm:$0xf]  ;;  %v2166_v63 = vld [vmem:[%s3720_s9] ss:$0 sm:$0xff] }
  0x11   :  { %2892 = vmatprep.subr.bf16.mxu1 %v2951_v0 }
  0x12   :  { %2424 = vmatmul.mubr.msk.f32.vlgmr.msra.gmra.mrb[0].mxu0 %vm89_vm1, %v78_v13  ;;  %v3182_v57 = vld [vmem:[%s3748_s28] sm:$0xff]  ;;  %v3187_v58 = vld [vmem:[%s3748_s28 + $0x10] sm:$0x3]  ;;  %v3202_v61 = vld [vmem:[%s3748_s28 + $0x8] sm:$0xff] }
  0x13   :  { %2426 = vmatprep.mubr.msk.f32.mxu0 %vm2952_vm0, %v2953_v4  ;;  %2453 = vmatmul.mubr.msk.f32.vlgmr.msra.gmra.mrb[0].mxu1 %vm89_vm1, %v78_v13 }
  0x14   :  { %2455 = vmatprep.mubr.msk.f32.mxu1 %vm2952_vm0, %v2953_v4 }
  0x16   :  { %2427 = vmatmul.mubr.msk.f32.gmra.mrb[2].mxu0 %vm89_vm1, %v79_v15 }
  0x17   :  { %2429 = vmatprep.mubr.msk.f32.mxu0 %vm2952_vm0, %v2953_v4  ;;  %2456 = vmatmul.mubr.msk.f32.gmra.mrb[2].mxu1 %vm89_vm1, %v79_v15 }
  0x18   :  { %2458 = vmatprep.mubr.msk.f32.mxu1 %vm2952_vm0, %v2953_v4 }
  0x1a   :  { %2430 = vmatmul.mubr.msk.f32.gmra.mrb[4].mxu0 %vm89_vm1, %v80_v16 }
  0x1b   :  { %2432 = vmatprep.mubr.msk.f32.mxu0 %vm2952_vm0, %v2953_v4  ;;  %2459 = vmatmul.mubr.msk.f32.gmra.mrb[4].mxu1 %vm89_vm1, %v80_v16 }
  0x1c   :  { %2461 = vmatprep.mubr.msk.f32.mxu1 %vm2952_vm0, %v2953_v4 }
  0x1e   :  { %2433 = vmatmul.mubr.msk.f32.gmra.mrb[6].mxu0 %vm89_vm1, %v81_v17 }
  0x1f   :  { %2435 = vmatprep.mubr.msk.f32.mxu0 %vm2952_vm0, %v2953_v4  ;;  %2462 = vmatmul.mubr.msk.f32.gmra.mrb[6].mxu1 %vm89_vm1, %v81_v17 }
  0x20   :  { %2464 = vmatprep.mubr.msk.f32.mxu1 %vm2952_vm0, %v2953_v4 }
  0x22   :  { %2436 = vmatmul.mubr.msk.f32.gmra.mrb[8].mxu0 %vm89_vm1, %v82_v18 }
  0x23   :  { %2438 = vmatprep.mubr.msk.f32.mxu0 %vm2952_vm0, %v2953_v4  ;;  %2465 = vmatmul.mubr.msk.f32.gmra.mrb[8].mxu1 %vm89_vm1, %v82_v18 }
  0x24   :  { %2467 = vmatprep.mubr.msk.f32.mxu1 %vm2952_vm0, %v2953_v4 }
  0x26   :  { %2439 = vmatmul.mubr.msk.f32.gmra.mrb[10].mxu0 %vm89_vm1, %v83_v19 }
  0x27   :  { %2441 = vmatprep.mubr.msk.f32.mxu0 %vm2952_vm0, %v2953_v4  ;;  %2468 = vmatmul.mubr.msk.f32.gmra.mrb[10].mxu1 %vm89_vm1, %v83_v19 }
  0x28   :  { %2470 = vmatprep.mubr.msk.f32.mxu1 %vm2952_vm0, %v2953_v4 }
  0x2a   :  { %2442 = vmatmul.mubr.msk.f32.gmra.mrb[12].mxu0 %vm89_vm1, %v84_v20 }
  0x2b   :  { %2487 = vmatprep.mubr.msk.f32.mxu0 %vm2952_vm0, %v2953_v4  ;;  %2471 = vmatmul.mubr.msk.f32.gmra.mrb[12].mxu1 %vm89_vm1, %v84_v20 }
  0x2c   :  { %2493 = vmatprep.mubr.msk.f32.mxu1 %vm2952_vm0, %v2953_v4 }
  0xe5   :  { %v177_v21 = vpop.f32.mrb[0].mxu0 }
  0xe6   :  { %v2425_v22 = vpop.f32.mrb[1].mxu0  ;;  %v3161_v24 = vpop.f32.mrb[0].mxu1  ;;  %v315_v25 = vmul.f32 %v177_v21, %v177_v21 }
  0xe7   :  { %v2454_v28 = vpop.f32.mrb[1].mxu1 }
  0xe9   :  { %v182_v23 = vpop.f32.mrb[2].mxu0 }
  0xea   :  { %v316_v26 = vmul.f32 %v182_v23, %v182_v23  ;;  %v2428_v27 = vpop.f32.mrb[3].mxu0  ;;  %v3163_v31 = vpop.f32.mrb[2].mxu1 }
  0xeb   :  { %v2457_v33 = vpop.f32.mrb[3].mxu1 }
  0xec   :  { %v2806_v29 = vpack.c.bf16 %v316_v26, %v315_v25 }
  0xed   :  { %v187_v30 = vpop.f32.mrb[4].mxu0 }
  0xee   :  { %v2431_v32 = vpop.f32.mrb[5].mxu0  ;;  %2807 = vmatpush3.bf16.msra.mxu0 %v2806_v29  ;;  %2896 = vmatpush3.bf16.msra.mxu1 %v2806_v29  ;;  %v3167_v35 = vpop.f32.mrb[4].mxu1  ;;  %v317_v36 = vmul.f32 %v187_v30, %v187_v30 }
  0xef   :  { %2808 = vmatprep.subr.bf16.mxu0 %v2951_v0  ;;  %2893 = vmatprep.subr.bf16.mxu1 %v2951_v0  ;;  %v2460_v39 = vpop.f32.mrb[5].mxu1 }
  0xf1   :  { %v192_v34 = vpop.f32.mrb[6].mxu0 }
  0xf2   :  { %v318_v37 = vmul.f32 %v192_v34, %v192_v34  ;;  %v2434_v38 = vpop.f32.mrb[7].mxu0  ;;  %v3169_v42 = vpop.f32.mrb[6].mxu1 }
  0xf3   :  { %v2463_v44 = vpop.f32.mrb[7].mxu1 }
  0xf4   :  { %v2809_v40 = vpack.c.bf16 %v318_v37, %v317_v36  ;;  %v661_v44 = vld [vmem:[%s3718_s10] sm:$0xff] }
  0xf5   :  { %v197_v41 = vpop.f32.mrb[8].mxu0 }
  0xf6   :  { %v2437_v43 = vpop.f32.mrb[9].mxu0  ;;  %2810 = vmatpush3.bf16.msra.mxu0 %v2809_v40  ;;  %2897 = vmatpush3.bf16.msra.mxu1 %v2809_v40  ;;  %v3173_v46 = vpop.f32.mrb[8].mxu1  ;;  %v319_v47 = vmul.f32 %v197_v41, %v197_v41 }
  0xf7   :  { %2811 = vmatprep.subr.bf16.mxu0 %v2951_v0  ;;  %2894 = vmatprep.subr.bf16.mxu1 %v2951_v0  ;;  %v2466_v50 = vpop.f32.mrb[9].mxu1 }
  0xf9   :  { %v202_v45 = vpop.f32.mrb[10].mxu0 }
  0xfa   :  { %v320_v48 = vmul.f32 %v202_v45, %v202_v45  ;;  %v2440_v49 = vpop.f32.mrb[11].mxu0  ;;  %v3175_v53 = vpop.f32.mrb[10].mxu1  ;;  %v662_v45 = vld [vmem:[%s3718_s10 + $0x8] sm:$0xff] }
  0xfb   :  { %v2469_v56 = vpop.f32.mrb[11].mxu1  ;;  %v783_v49 = vld [vmem:[%s3719_s12 + $0x8] sm:$0xff] }
  0xfc   :  { %v2812_v51 = vpack.c.bf16 %v320_v48, %v319_v47  ;;  %v782_v47 = vld [vmem:[%s3719_s12] sm:$0xff]  ;;  %v2824_v48 = vpack.c.bf16 %v662_v45, %v661_v44  ;;  %v785_v56 = vld [vmem:[%s3719_s12 + $0x18] sm:$0xff] }
  0xfd   :  { %v207_v52 = vpop.f32.mrb[12].mxu0  ;;  %v2830_v50 = vpack.c.bf16 %v783_v49, %v782_v47 }
  0xfe   :  { %v321_v54 = vmul.f32 %v207_v52, %v207_v52  ;;  %2813 = vmatpush3.bf16.msra.mxu0 %v2812_v51  ;;  %2898 = vmatpush3.bf16.msra.mxu1 %v2812_v51  ;;  %v2443_v55 = vpop.f32.mrb[13].mxu0  ;;  %v3189_v59 = vpop.f32.mrb[12].mxu1  ;;  %v663_v51 = vld [vmem:[%s3718_s10 + $0x10] sm:$0xff]  ;;  %v664_v52 = vld [vmem:[%s3718_s10 + $0x18] sm:$0xff] }
  0xff   :  { %2485 = vmatprep.subr.mxu0 %v2953_v4  ;;  %2895 = vmatprep.subr.mxu1 %v2953_v4  ;;  %v2472_v60 = vpop.f32.mrb[13].mxu1  ;;  %v2827_v55 = vpack.c.bf16 %v664_v52, %v663_v51  ;;  %v1134_v51 = vld [vmem:[%s3723_s15 + $0x8] sm:$0xff] }
 0x102   :  { %2486 = vmatpush3.msk.msra.mxu0 %vm332_vm2, %v321_v54  ;;  %2899 = vmatpush3.msk.msra.mxu1 %vm332_vm2, %v321_v54  ;;  %v784_v54 = vld [vmem:[%s3719_s12 + $0x10] sm:$0xff] }
 0x103   :  { %2488 = vmatmul.mubr.msk.f32.vlgmr.msra.gmra.mrb[14].mxu0 %vm322_vm3, %v3182_v57  ;;  %2494 = vmatmul.mubr.msk.f32.vlgmr.msra.gmra.mrb[14].mxu1 %vm322_vm3, %v3187_v58  ;;  %v2833_v60 = vpack.c.bf16 %v785_v56, %v784_v54  ;;  %v3334_v56 = vld [vmem:[%s3724_s3] sm:$0xff] }
 0x104   :  { %2490 = vmatprep.mubr.msk.f32.mxu0 %vm2952_vm0, %v2953_v4  ;;  %2817 = vmatprep.subr.bf16.mxu0 %v2951_v0 }
 0x105   :  { %2814 = vmatprep.subr.bf16.mxu1 %v2951_v0  ;;  %2502 = vmatprep.mubr.msk.f32.mxu1 %vm2952_vm0, %v2953_v4 }
 0x106   :  { %2819 = vmatpush3.bf16.msra.mxu0 %v2818_v1  ;;  %2816 = vmatpush3.bf16.msra.mxu1 %v2815_v5 }
 0x107   :  { %2491 = vmatmul.mubr.msk.f32.gmra.mrb[16].mxu0 %vm322_vm3, %v3202_v61  ;;  %2820 = vmatprep.subr.bf16.mxu0 %v2951_v0 }
 0x108   :  { %2519 = vmatprep.mubr.msk.f32.mxu0 %vm2952_vm0, %v2953_v4  ;;  %2500 = vmatprep.subr.mxu1 %v2953_v4 }
 0x10a   :  { %2822 = vmatpush3.bf16.msra.mxu0 %v2821_v8  ;;  %2501 = vmatpush3.msk.msra.mxu1 %vm457_vm4, %v446_v9 }
 0x10b   :  { %2829 = vmatprep.subr.bf16.mxu0 %v2951_v0  ;;  %2823 = vmatprep.subr.bf16.mxu1 %v2951_v0 }
 0x10d   :  { %2520 = vmatmul.mubr.msk.f32.vlgmr.msra.gmra.mrb[18].mxu0 %vm89_vm1, %v437_v10 }
 0x10e   :  { %2522 = vmatprep.mubr.msk.f32.mxu0 %vm2952_vm0, %v2953_v4  ;;  %2831 = vmatpush3.bf16.msra.mxu0 %v2830_v50  ;;  %v1133_v50 = vld [vmem:[%s3723_s15] sm:$0xff] }
 0x10f   :  { %2832 = vmatprep.subr.bf16.mxu0 %v2951_v0 }
 0x111   :  { %2523 = vmatmul.mubr.msk.f32.gmra.mrb[20].mxu0 %vm89_vm1, %v438_v11 }
 0x112   :  { %2525 = vmatprep.mubr.msk.f32.mxu0 %vm2952_vm0, %v2953_v4  ;;  %2834 = vmatpush3.bf16.msra.mxu0 %v2833_v60  ;;  %v2842_v60 = vpack.c.bf16 %v1134_v51, %v1133_v50 }
 0x113   :  { %2838 = vmatprep.subr.bf16.mxu0 %v2951_v0 }
 0x115   :  { %2526 = vmatmul.mubr.msk.f32.gmra.mrb[22].mxu0 %vm89_vm1, %v439_v12 }
 0x116   :  { %2553 = vmatprep.mubr.msk.f32.mxu0 %vm2952_vm0, %v2953_v4 }
 0x1d6   :  { %v402_v13 = vpop.f32.mrb[14].mxu0  ;;  %v412_v14 = vpop.f32.mrb[14].mxu1 }
 0x1d7   :  { %2903 = vrsqrt.f32 %v402_v13  ;;  %v2489_v15 = vpop.f32.mrb[15].mxu0  ;;  %v2495_v16 = vpop.f32.mrb[15].mxu1  ;;  %vm418_vm5 = vcmp.eq.f32.partialorder %v402_v13, inf  ;;  %v421_v22 = vand.u32 2147483648, %v402_v13  ;;  %vm420_vm7 = vcmp.eq.f32.partialorder %v402_v13, 0.0 }
 0x1d8   :  { %2905 = vrsqrt.f32 %v412_v14  ;;  %vm432_vm10 = vcmp.eq.f32.partialorder %v412_v14, inf  ;;  %v435_v34 = vand.u32 2147483648, %v412_v14  ;;  %vm434_vm11 = vcmp.eq.f32.partialorder %v412_v14, 0.0 }
 0x1da   :  { %v407_v17 = vpop.f32.mrb[16].mxu0 }
 0x1db   :  { %2907 = vrsqrt.f32 %v407_v17  ;;  %v2492_v18 = vpop.f32.mrb[17].mxu0  ;;  %vm425_vm8 = vcmp.eq.f32.partialorder %v407_v17, inf  ;;  %v428_v29 = vand.u32 2147483648, %v407_v17  ;;  %vm427_vm9 = vcmp.eq.f32.partialorder %v407_v17, 0.0 }
 0x1e0   :  { %v616_v37 = vpop.f32.mrb[18].mxu0 }
 0x1e1   :  { %v2904_v19 = vpop.eup %2903  ;;  %v2521_v38 = vpop.f32.mrb[19].mxu0 }
 0x1e2   :  { %v417_v20 = vmul.f32 %v2904_v19, %v402_v13  ;;  %v2906_v21 = vpop.eup %2905  ;;  %v2177_v38 = vld [vmem:[%s3722_s13] ss:$0 sm:$0xff] }
 0x1e3   :  { %v431_v28 = vmul.f32 %v2906_v21, %v412_v14 }
 0x1e4   :  { %v419_v23 = vsel %vm418_vm5, %v402_v13, %v417_v20  ;;  %v621_v39 = vpop.f32.mrb[20].mxu0 }
 0x1e5   :  { %v2908_v25 = vpop.eup %2907  ;;  %v422_v26 = vsel %vm420_vm7, %v421_v22, %v419_v23  ;;  %v433_v33 = vsel %vm432_vm10, %v412_v14, %v431_v28  ;;  %v2524_v40 = vpop.f32.mrb[21].mxu0  ;;  %vm2007_vm7 = vcmask 220160  }
 0x1e6   :  { %2503 = vmatmul.mubr.msk.f32.vlgmr.msra.gmra.mrb[16].mxu1 %vm447_vm6, %v422_v26  ;;  %v424_v27 = vmul.f32 %v2908_v25, %v407_v17  ;;  %v436_v36 = vsel %vm434_vm11, %v435_v34, %v433_v33 }
 0x1e7   :  { %2505 = vmatprep.mubr.msk.f32.mxu1 %vm2952_vm0, %v2953_v4  ;;  %2825 = vmatpush3.bf16.msra.mxu1 %v2824_v48 }
 0x1e8   :  { %v426_v30 = vsel %vm425_vm8, %v407_v17, %v424_v27  ;;  %v626_v41 = vpop.f32.mrb[22].mxu0  ;;  %2826 = vmatprep.subr.bf16.mxu1 %v2951_v0  ;;  %vm2011_vm8 = vcmask 215040  }
 0x1e9   :  { %v429_v32 = vsel %vm427_vm9, %v428_v29, %v426_v30  ;;  %v2527_v43 = vpop.f32.mrb[23].mxu0  ;;  %v1006_v29 = vld [vmem:[%s3721_s14] sm:$0xff]  ;;  %v1007_v30 = vld [vmem:[%s3721_s14 + $0x8] sm:$0xff] }
 0x1ea   :  { %2506 = vmatmul.mubr.msk.f32.gmra.mrb[18].mxu1 %vm447_vm6, %v429_v32  ;;  %v2839_v32 = vpack.c.bf16 %v1007_v30, %v1006_v29 }
 0x1eb   :  { %2508 = vmatprep.mubr.msk.f32.mxu1 %vm2952_vm0, %v2953_v4  ;;  %2828 = vmatpush3.bf16.msra.mxu1 %v2827_v55 }
 0x1ec   :  { %2835 = vmatprep.subr.bf16.mxu1 %v2951_v0 }
 0x1ee   :  { %2509 = vmatmul.mubr.msk.f32.gmra.mrb[20].mxu1 %vm447_vm6, %v436_v36 }
 0x1ef   :  { %2536 = vmatprep.mubr.msk.f32.mxu1 %vm2952_vm0, %v2953_v4 }
 0x2b9   :  { %v527_v62 = vpop.f32.mrb[16].mxu1 }
 0x2ba   :  { %v617_v1 = vadd.f32 %v616_v37, %v527_v62  ;;  %v2504_v2 = vpop.f32.mrb[17].mxu1  ;;  %v3345_v62 = vld [vmem:[%s3724_s3 + $0x8] sm:$0xff] }
 0x2bb   :  { %v3373_v2 = vld [vmem:[%s3724_s3 + $0x20] sm:$0xff] }
 0x2bc   :  { %v637_v3 = vadd.f32 %v2166_v63, %v617_v1  ;;  %v3364_v1 = vld [vmem:[%s3724_s3 + $0x18] sm:$0xff] }
 0x2bd   :  { %v532_v5 = vpop.f32.mrb[18].mxu1 }
 0x2be   :  { %v2167_v6 = vmul.f32 -1.442695, %v637_v3  ;;  %v622_v7 = vadd.f32 %v621_v39, %v532_v5  ;;  %v2507_v8 = vpop.f32.mrb[19].mxu1  ;;  %v3391_v5 = vld [vmem:[%s3724_s3 + $0x30] sm:$0x3f] }
 0x2bf   :  { %v2170_v8 = vld [vmem:[%s3725_s11] ss:$0 sm:$0xff] }
 0x2c0   :  { %2909 = vpow2.f32 %v2167_v6  ;;  %v638_v9 = vadd.f32 %v2166_v63, %v622_v7  ;;  %v1008_v6 = vld [vmem:[%s3721_s14 + $0x10] sm:$0xf] }
 0x2c1   :  { %v537_v10 = vpop.f32.mrb[20].mxu1  ;;  %v1135_v7 = vld [vmem:[%s3723_s15 + $0x10] sm:$0xf] }
 0x2c2   :  { %v2168_v11 = vmul.f32 -1.442695, %v638_v9  ;;  %v627_v12 = vadd.f32 %v626_v41, %v537_v10  ;;  %v2510_v13 = vpop.f32.mrb[21].mxu1 }
 0x2c3   :  { %v1351_v13 = vld [vmem:[%s3726_s16 + $0x8] sm:$0xff] }
 0x2c4   :  { %2911 = vpow2.f32 %v2168_v11  ;;  %v639_v14 = vadd.f32 %v2166_v63, %v627_v12  ;;  %v3355_v63 = vld [vmem:[%s3724_s3 + $0x10] sm:$0xff]  ;;  %v1350_v12 = vld [vmem:[%s3726_s16] sm:$0xff] }
 0x2c6   :  { %v2169_v15 = vmul.f32 -1.442695, %v639_v14 }
 0x2c8   :  { %2913 = vpow2.f32 %v2169_v15 }
 0x2ca   :  { %v2910_v16 = vpop.eup %2909 }
 0x2cb   :  { %v649_v17 = vadd.f32 1.0, %v2910_v16 }
 0x2cd   :  { %2915 = vrcp.f32 %v649_v17 }
 0x2ce   :  { %v2912_v18 = vpop.eup %2911 }
 0x2cf   :  { %v650_v19 = vadd.f32 1.0, %v2912_v18 }
 0x2d1   :  { %2917 = vrcp.f32 %v650_v19  ;;  %v2857_v19 = vpack.c.bf16 %v1351_v13, %v1350_v12 }
 0x2d2   :  { %v2914_v20 = vpop.eup %2913 }
 0x2d3   :  { %v651_v21 = vadd.f32 1.0, %v2914_v20 }
 0x2d5   :  { %2919 = vrcp.f32 %v651_v21 }
 0x2d7   :  { %v2916_v22 = vpop.eup %2915 }
 0x2d8   :  { %v658_v23 = vmul.f32 %v2916_v22, %v637_v3  ;;  %v3382_v3 = vld [vmem:[%s3724_s3 + $0x28] sm:$0xff] }
 0x2da   :  { %2537 = vmatmul.mubr.msk.f32.vlgmr.msra.gmra.mrb[22].mxu1 %vm89_vm1, %v658_v23  ;;  %2554 = vmatmul.mubr.msk.f32.vlgmr.msra.gmra.mrb[24].mxu0 %vm89_vm1, %v658_v23 }
 0x2db   :  { %v2918_v25 = vpop.eup %2917  ;;  %2539 = vmatprep.mubr.msk.f32.mxu1 %vm2952_vm0, %v2953_v4  ;;  %2556 = vmatprep.mubr.msk.f32.mxu0 %vm2952_vm0, %v2953_v4 }
 0x2dc   :  { %v659_v26 = vmul.f32 %v2918_v25, %v638_v9  ;;  %2840 = vmatpush3.bf16.msra.mxu0 %v2839_v32 }
 0x2dd   :  { %2593 = vmatprep.subr.mxu0 %v2953_v4 }
 0x2de   :  { %2540 = vmatmul.mubr.msk.f32.gmra.mrb[24].mxu1 %vm89_vm1, %v659_v26  ;;  %2557 = vmatmul.mubr.msk.f32.gmra.mrb[26].mxu0 %vm89_vm1, %v659_v26 }
 0x2df   :  { %v2920_v27 = vpop.eup %2919  ;;  %2542 = vmatprep.mubr.msk.f32.mxu1 %vm2952_vm0, %v2953_v4  ;;  %2559 = vmatprep.mubr.msk.f32.mxu0 %vm2952_vm0, %v2953_v4 }
 0x2e0   :  { %v660_v28 = vmul.f32 %v2920_v27, %v639_v14  ;;  %2594 = vmatpush3.msk.msra.mxu0 %vm457_vm4, %v1008_v6 }
 0x2e1   :  { %2844 = vmatprep.subr.bf16.mxu0 %v2951_v0 }
 0x2e2   :  { %2543 = vmatmul.mubr.msk.f32.gmra.mrb[26].mxu1 %vm89_vm1, %v660_v28  ;;  %2560 = vmatmul.mubr.msk.f32.gmra.mrb[28].mxu0 %vm89_vm1, %v660_v28 }
 0x2e3   :  { %2568 = vmatprep.mubr.msk.f32.mxu1 %vm2952_vm0, %v2953_v4  ;;  %2595 = vmatprep.mubr.msk.f32.mxu0 %vm2952_vm0, %v2953_v4 }
 0x3ad   :  { %v747_v33 = vpop.f32.mrb[22].mxu1  ;;  %v859_v34 = vpop.f32.mrb[24].mxu0 }
 0x3ae   :  { %v2538_v36 = vpop.f32.mrb[23].mxu1  ;;  %v2555_v37 = vpop.f32.mrb[25].mxu0  ;;  %v860_v41 = vadd.f32 %v2177_v38, %v859_v34  ;;  %v3410_v9 = vadd.f32 %v2170_v8, %v747_v33 }
 0x3b0   :  { %v2174_v10 = vmul.f32 -1.442695, %v3410_v9 }
 0x3b1   :  { %v752_v39 = vpop.f32.mrb[24].mxu1  ;;  %v864_v40 = vpop.f32.mrb[26].mxu0 }
 0x3b2   :  { %v865_v43 = vadd.f32 %v2177_v38, %v864_v40  ;;  %v2541_v44 = vpop.f32.mrb[25].mxu1  ;;  %v2558_v45 = vpop.f32.mrb[27].mxu0  ;;  %v3413_v11 = vadd.f32 %v2170_v8, %v752_v39  ;;  %2921 = vpow2.f32 %v2174_v10 }
 0x3b4   :  { %v2836_v47 = vpack.c.bf16 %v865_v43, %v860_v41  ;;  %v2175_v14 = vmul.f32 -1.442695, %v3413_v11 }
 0x3b5   :  { %v757_v48 = vpop.f32.mrb[26].mxu1  ;;  %v869_v49 = vpop.f32.mrb[28].mxu0 }
 0x3b6   :  { %v2544_v52 = vpop.f32.mrb[27].mxu1  ;;  %v2561_v54 = vpop.f32.mrb[29].mxu0  ;;  %2837 = vmatpush3.bf16.msra.mxu1 %v2836_v47  ;;  %v870_v55 = vadd.f32 %v2177_v38, %v869_v49  ;;  %v3422_v15 = vadd.f32 %v2170_v8, %v757_v48  ;;  %2923 = vpow2.f32 %v2175_v14 }
 0x3b7   :  { %2566 = vmatprep.subr.mxu1 %v2953_v4 }
 0x3b8   :  { %v2176_v20 = vmul.f32 -1.442695, %v3422_v15 }
 0x3ba   :  { %2567 = vmatpush3.msk.msra.mxu1 %vm895_vm12, %v870_v55  ;;  %2925 = vpow2.f32 %v2176_v20 }
 0x3bb   :  { %2569 = vmatmul.mubr.msk.f32.vlgmr.msra.gmra.mrb[28].mxu1 %vm873_vm13, %v3334_v56  ;;  %2841 = vmatprep.subr.bf16.mxu1 %v2951_v0 }
 0x3bc   :  { %2571 = vmatprep.mubr.msk.f32.mxu1 %vm2952_vm0, %v2953_v4  ;;  %2843 = vmatpush3.bf16.msra.mxu1 %v2842_v60 }
 0x3bd   :  { %2620 = vmatprep.subr.mxu1 %v2953_v4 }
 0x3bf   :  { %2572 = vmatmul.mubr.msk.f32.gmra.mrb[30].mxu1 %vm873_vm13, %v3345_v62 }
 0x3c0   :  { %2574 = vmatprep.mubr.msk.f32.mxu1 %vm2952_vm0, %v2953_v4  ;;  %2621 = vmatpush3.msk.msra.mxu1 %vm457_vm4, %v1135_v7 }
 0x3c1   :  { %2856 = vmatprep.subr.bf16.mxu1 %v2951_v0 }
 0x3c3   :  { %2575 = vmatmul.mubr.msk.f32.gmra.mrb[32].mxu1 %vm873_vm13, %v3355_v63 }
 0x3c4   :  { %2577 = vmatprep.mubr.msk.f32.mxu1 %vm2952_vm0, %v2953_v4 }
 0x3c7   :  { %2578 = vmatmul.mubr.msk.f32.gmra.mrb[34].mxu1 %vm873_vm13, %v3364_v1 }
 0x3c8   :  { %2580 = vmatprep.mubr.msk.f32.mxu1 %vm2952_vm0, %v2953_v4 }
 0x3cb   :  { %2581 = vmatmul.mubr.msk.f32.gmra.mrb[36].mxu1 %vm873_vm13, %v3373_v2 }
 0x3cc   :  { %2583 = vmatprep.mubr.msk.f32.mxu1 %vm2952_vm0, %v2953_v4 }
 0x3cf   :  { %2584 = vmatmul.mubr.msk.f32.gmra.mrb[38].mxu1 %vm873_vm13, %v3382_v3 }
 0x3d0   :  { %2586 = vmatprep.mubr.msk.f32.mxu1 %vm2952_vm0, %v2953_v4 }
 0x3d3   :  { %2587 = vmatmul.mubr.msk.f32.gmra.mrb[40].mxu1 %vm873_vm13, %v3391_v5 }
 0x3d4   :  { %2622 = vmatprep.mubr.msk.f32.mxu1 %vm2952_vm0, %v2953_v4 }
 0x48e   :  { %v965_v16 = vpop.f32.mrb[28].mxu1 }
 0x48f   :  { %v999_v17 = vmul.f32 %v965_v16, %v3161_v24  ;;  %v2570_v18 = vpop.f32.mrb[29].mxu1  ;;  %v1352_v24 = vld [vmem:[%s3726_s16 + $0x10] sm:$0xf] }
 0x491   :  { %2596 = vmatmul.mubr.msk.f32.vlgmr.msra.gmra.mrb[30].mxu0 %vm447_vm6, %v999_v17  ;;  %2623 = vmatmul.mubr.msk.f32.vlgmr.msra.gmra.mrb[42].mxu1 %vm447_vm6, %v999_v17 }
 0x492   :  { %v970_v21 = vpop.f32.mrb[30].mxu1  ;;  %2598 = vmatprep.mubr.msk.f32.mxu0 %vm2952_vm0, %v2953_v4  ;;  %2625 = vmatprep.mubr.msk.f32.mxu1 %vm2952_vm0, %v2953_v4 }
 0x493   :  { %v1000_v22 = vmul.f32 %v970_v21, %v3163_v31  ;;  %v2573_v23 = vpop.f32.mrb[31].mxu1  ;;  %2858 = vmatpush3.bf16.msra.mxu1 %v2857_v19  ;;  %v2922_v31 = vpop.eup %2921 }
 0x494   :  { %2685 = vmatprep.subr.mxu1 %v2953_v4  ;;  %v770_v28 = vadd.f32 1.0, %v2922_v31  ;;  %v2924_v30 = vpop.eup %2923 }
 0x495   :  { %2599 = vmatmul.mubr.msk.f32.gmra.mrb[32].mxu0 %vm447_vm6, %v1000_v22  ;;  %2626 = vmatmul.mubr.msk.f32.gmra.mrb[44].mxu1 %vm447_vm6, %v1000_v22  ;;  %v771_v33 = vadd.f32 1.0, %v2924_v30  ;;  %v2926_v36 = vpop.eup %2925 }
 0x496   :  { %v975_v25 = vpop.f32.mrb[32].mxu1  ;;  %2601 = vmatprep.mubr.msk.f32.mxu0 %vm2952_vm0, %v2953_v4  ;;  %2628 = vmatprep.mubr.msk.f32.mxu1 %vm2952_vm0, %v2953_v4  ;;  %2927 = vrcp.f32 %v770_v28 }
 0x497   :  { %v1001_v26 = vmul.f32 %v975_v25, %v3167_v35  ;;  %v2576_v27 = vpop.f32.mrb[33].mxu1  ;;  %2686 = vmatpush3.msk.msra.mxu1 %vm457_vm4, %v1352_v24  ;;  %2929 = vrcp.f32 %v771_v33 }
 0x498   :  { %2862 = vmatprep.subr.bf16.mxu1 %v2951_v0 }
 0x499   :  { %2602 = vmatmul.mubr.msk.f32.gmra.mrb[34].mxu0 %vm447_vm6, %v1001_v26  ;;  %2629 = vmatmul.mubr.msk.f32.gmra.mrb[46].mxu1 %vm447_vm6, %v1001_v26 }
 0x49a   :  { %v980_v29 = vpop.f32.mrb[34].mxu1  ;;  %2604 = vmatprep.mubr.msk.f32.mxu0 %vm2952_vm0, %v2953_v4  ;;  %2631 = vmatprep.mubr.msk.f32.mxu1 %vm2952_vm0, %v2953_v4 }
 0x49b   :  { %v1002_v35 = vmul.f32 %v980_v29, %v3169_v42  ;;  %v2579_v32 = vpop.f32.mrb[35].mxu1  ;;  %v772_v42 = vadd.f32 1.0, %v2926_v36 }
 0x49d   :  { %2605 = vmatmul.mubr.msk.f32.gmra.mrb[36].mxu0 %vm447_vm6, %v1002_v35  ;;  %2632 = vmatmul.mubr.msk.f32.gmra.mrb[48].mxu1 %vm447_vm6, %v1002_v35  ;;  %2931 = vrcp.f32 %v772_v42 }
 0x49e   :  { %v985_v34 = vpop.f32.mrb[36].mxu1  ;;  %2607 = vmatprep.mubr.msk.f32.mxu0 %vm2952_vm0, %v2953_v4  ;;  %2634 = vmatprep.mubr.msk.f32.mxu1 %vm2952_vm0, %v2953_v4 }
 0x49f   :  { %v1003_v37 = vmul.f32 %v985_v34, %v3173_v46  ;;  %v2582_v38 = vpop.f32.mrb[37].mxu1 }
 0x4a0   :  { %v2928_v45 = vpop.eup %2927 }
 0x4a1   :  { %2608 = vmatmul.mubr.msk.f32.gmra.mrb[38].mxu0 %vm447_vm6, %v1003_v37  ;;  %2635 = vmatmul.mubr.msk.f32.gmra.mrb[50].mxu1 %vm447_vm6, %v1003_v37  ;;  %v2930_v47 = vpop.eup %2929 }
 0x4a2   :  { %v990_v39 = vpop.f32.mrb[38].mxu1  ;;  %2610 = vmatprep.mubr.msk.f32.mxu0 %vm2952_vm0, %v2953_v4  ;;  %2637 = vmatprep.mubr.msk.f32.mxu1 %vm2952_vm0, %v2953_v4 }
 0x4a3   :  { %v1004_v40 = vmul.f32 %v990_v39, %v3175_v53  ;;  %v2585_v41 = vpop.f32.mrb[39].mxu1  ;;  %v779_v53 = vmul.f32 %v2928_v45, %v3410_v9 }
 0x4a5   :  { %2611 = vmatmul.mubr.msk.f32.gmra.mrb[40].mxu0 %vm447_vm6, %v1004_v40  ;;  %2638 = vmatmul.mubr.msk.f32.gmra.mrb[52].mxu1 %vm447_vm6, %v1004_v40 }
 0x4a6   :  { %v995_v46 = vpop.f32.mrb[40].mxu1  ;;  %2613 = vmatprep.mubr.msk.f32.mxu0 %vm2952_vm0, %v2953_v4  ;;  %2640 = vmatprep.mubr.msk.f32.mxu1 %vm2952_vm0, %v2953_v4 }
 0x4a7   :  { %v1005_v43 = vmul.f32 %v995_v46, %v3189_v59  ;;  %v2588_v44 = vpop.f32.mrb[41].mxu1  ;;  %v780_v59 = vmul.f32 %v2930_v47, %v3413_v11  ;;  %v2932_v48 = vpop.eup %2931 }
 0x4a8   :  { %v781_v49 = vmul.f32 %v2932_v48, %v3422_v15  ;;  %v1355_v44 = vld [vmem:[%s3727_s17 + $0x10] sm:$0xf] }
 0x4a9   :  { %2614 = vmatmul.mubr.msk.f32.gmra.mrb[42].mxu0 %vm447_vm6, %v1005_v43  ;;  %2641 = vmatmul.mubr.msk.f32.gmra.mrb[54].mxu1 %vm447_vm6, %v1005_v43 }
 0x4aa   :  { %2687 = vmatprep.mubr.msk.f32.mxu1 %vm2952_vm0, %v2953_v4  ;;  %2657 = vmatprep.mubr.msk.f32.mxu0 %vm2952_vm0, %v2953_v4 }
 0x4ad   :  { %2688 = vmatmul.mubr.msk.f32.vlgmr.msra.gmra.mrb[56].mxu1 %vm447_vm6, %v779_v53 }
 0x4ae   :  { %2690 = vmatprep.mubr.msk.f32.mxu1 %vm2952_vm0, %v2953_v4 }
 0x4b1   :  { %2691 = vmatmul.mubr.msk.f32.gmra.mrb[58].mxu1 %vm447_vm6, %v780_v59 }
 0x4b2   :  { %2693 = vmatprep.mubr.msk.f32.mxu1 %vm2952_vm0, %v2953_v4 }
 0x4b5   :  { %2694 = vmatmul.mubr.msk.f32.gmra.mrb[60].mxu1 %vm447_vm6, %v781_v49 }
 0x4b6   :  { %2717 = vmatprep.mubr.msk.f32.mxu1 %vm2952_vm0, %v2953_v4 }
 0x564   :  { %v1099_v50 = vpop.f32.mrb[30].mxu0  ;;  %v3492_v51 = vpop.f32.mrb[42].mxu1 }
 0x565   :  { %v2597_v52 = vpop.f32.mrb[31].mxu0  ;;  %v2624_v54 = vpop.f32.mrb[43].mxu1  ;;  %v1239_v6 = vmul.f32 %v1099_v50, %v1099_v50 }
 0x568   :  { %v1104_v55 = vpop.f32.mrb[32].mxu0  ;;  %v3494_v60 = vpop.f32.mrb[44].mxu1 }
 0x569   :  { %v1240_v7 = vmul.f32 %v1104_v55, %v1104_v55  ;;  %v2600_v8 = vpop.f32.mrb[33].mxu0  ;;  %v2627_v9 = vpop.f32.mrb[45].mxu1 }
 0x56b   :  { %v2845_v10 = vpack.c.bf16 %v1240_v7, %v1239_v6 }
 0x56c   :  { %v1109_v11 = vpop.f32.mrb[34].mxu0  ;;  %v3496_v12 = vpop.f32.mrb[46].mxu1 }
 0x56d   :  { %v2603_v13 = vpop.f32.mrb[35].mxu0  ;;  %v2630_v14 = vpop.f32.mrb[47].mxu1  ;;  %2846 = vmatpush3.bf16.msra.mxu0 %v2845_v10  ;;  %v1241_v17 = vmul.f32 %v1109_v11, %v1109_v11 }
 0x56e   :  { %2847 = vmatprep.subr.bf16.mxu0 %v2951_v0 }
 0x570   :  { %v1114_v15 = vpop.f32.mrb[36].mxu0  ;;  %v3499_v16 = vpop.f32.mrb[48].mxu1 }
 0x571   :  { %v1242_v18 = vmul.f32 %v1114_v15, %v1114_v15  ;;  %v2606_v19 = vpop.f32.mrb[37].mxu0  ;;  %v2633_v20 = vpop.f32.mrb[49].mxu1 }
 0x572   :  { %v1572_v19 = vld [vmem:[%s3728_s19 + $0x8] sm:$0xff] }
 0x573   :  { %v2848_v21 = vpack.c.bf16 %v1242_v18, %v1241_v17  ;;  %v1571_v18 = vld [vmem:[%s3728_s19] sm:$0xff] }
 0x574   :  { %v1119_v22 = vpop.f32.mrb[38].mxu0  ;;  %v3501_v23 = vpop.f32.mrb[50].mxu1  ;;  %v2860_v20 = vpack.c.bf16 %v1572_v19, %v1571_v18 }
 0x575   :  { %v2609_v24 = vpop.f32.mrb[39].mxu0  ;;  %v2636_v25 = vpop.f32.mrb[51].mxu1  ;;  %2849 = vmatpush3.bf16.msra.mxu0 %v2848_v21  ;;  %v1243_v27 = vmul.f32 %v1119_v22, %v1119_v22  ;;  %v1573_v21 = vld [vmem:[%s3728_s19 + $0x10] sm:$0xf] }
 0x576   :  { %2850 = vmatprep.subr.bf16.mxu0 %v2951_v0  ;;  %v2217_v24 = vld [vmem:[%s3729_s18] ss:$0 sm:$0xff] }
 0x578   :  { %v1124_v31 = vpop.f32.mrb[40].mxu0  ;;  %v3504_v26 = vpop.f32.mrb[52].mxu1 }
 0x579   :  { %v1244_v28 = vmul.f32 %v1124_v31, %v1124_v31  ;;  %v2612_v29 = vpop.f32.mrb[41].mxu0  ;;  %v2639_v30 = vpop.f32.mrb[53].mxu1 }
 0x57b   :  { %v2851_v35 = vpack.c.bf16 %v1244_v28, %v1243_v27 }
 0x57c   :  { %v1129_v32 = vpop.f32.mrb[42].mxu0  ;;  %v3506_v33 = vpop.f32.mrb[54].mxu1 }
 0x57d   :  { %v2615_v34 = vpop.f32.mrb[43].mxu0  ;;  %v2642_v36 = vpop.f32.mrb[55].mxu1  ;;  %2852 = vmatpush3.bf16.msra.mxu0 %v2851_v35  ;;  %v1245_v37 = vmul.f32 %v1129_v32, %v1129_v32 }
 0x57e   :  { %2655 = vmatprep.subr.mxu0 %v2953_v4 }
 0x580   :  { %v3509_v38 = vpop.f32.mrb[56].mxu1 }
 0x581   :  { %2656 = vmatpush3.msk.msra.mxu0 %vm332_vm2, %v1245_v37  ;;  %v2689_v42 = vpop.f32.mrb[57].mxu1 }
 0x582   :  { %2658 = vmatmul.mubr.msk.f32.vlgmr.msra.gmra.mrb[44].mxu0 %vm322_vm3, %v3182_v57  ;;  %2853 = vmatprep.subr.bf16.mxu0 %v2951_v0  ;;  %v1353_v57 = vld [vmem:[%s3727_s17] sm:$0xff] }
 0x583   :  { %2660 = vmatprep.mubr.msk.f32.mxu0 %vm2952_vm0, %v2953_v4 }
 0x584   :  { %v3517_v39 = vpop.f32.mrb[58].mxu1 }
 0x585   :  { %v2692_v40 = vpop.f32.mrb[59].mxu1 }
 0x586   :  { %2661 = vmatmul.mubr.msk.f32.gmra.mrb[46].mxu0 %vm322_vm3, %v3202_v61  ;;  %v1354_v61 = vld [vmem:[%s3727_s17 + $0x8] sm:$0xff] }
 0x587   :  { %2663 = vmatprep.mubr.msk.f32.mxu0 %vm2952_vm0, %v2953_v4  ;;  %v2854_v43 = vpack.c.bf16 %v1354_v61, %v1353_v57 }
 0x588   :  { %v3523_v41 = vpop.f32.mrb[60].mxu1 }
 0x589   :  { %v2695_v46 = vpop.f32.mrb[61].mxu1  ;;  %2855 = vmatpush3.bf16.msra.mxu0 %v2854_v43 }
 0x58a   :  { %2664 = vmatmul.mubr.msk.f32.gmra.mrb[48].mxu0 %vm322_vm3, %v3187_v58  ;;  %2670 = vmatprep.subr.mxu0 %v2953_v4 }
 0x58b   :  { %2672 = vmatprep.mubr.msk.f32.mxu0 %vm2952_vm0, %v2953_v4 }
 0x58d   :  { %2671 = vmatpush3.msk.msra.mxu0 %vm457_vm4, %v1355_v44 }
 0x58e   :  { %2859 = vmatprep.subr.bf16.mxu0 %v2951_v0 }
 0x655   :  { %v1315_v58 = vpop.f32.mrb[44].mxu0 }
 0x656   :  { %2933 = vrsqrt.f32 %v1315_v58  ;;  %v2659_v45 = vpop.f32.mrb[45].mxu0  ;;  %vm1331_vm14 = vcmp.eq.f32.partialorder %v1315_v58, inf  ;;  %v1334_v52 = vand.u32 2147483648, %v1315_v58  ;;  %vm1333_vm15 = vcmp.eq.f32.partialorder %v1315_v58, 0.0 }
 0x659   :  { %v1320_v53 = vpop.f32.mrb[46].mxu0 }
 0x65a   :  { %2935 = vrsqrt.f32 %v1320_v53  ;;  %v2662_v47 = vpop.f32.mrb[47].mxu0  ;;  %vm1338_vm1 = vcmp.eq.f32.partialorder %v1320_v53, inf  ;;  %v1341_v8 = vand.u32 2147483648, %v1320_v53  ;;  %vm1340_vm2 = vcmp.eq.f32.partialorder %v1320_v53, 0.0 }
 0x65d   :  { %v1325_v59 = vpop.f32.mrb[48].mxu0 }
 0x65e   :  { %2937 = vrsqrt.f32 %v1325_v59  ;;  %v2665_v48 = vpop.f32.mrb[49].mxu0  ;;  %vm1345_vm3 = vcmp.eq.f32.partialorder %v1325_v59, inf  ;;  %v1348_v14 = vand.u32 2147483648, %v1325_v59  ;;  %vm1347_vm5 = vcmp.eq.f32.partialorder %v1325_v59, 0.0 }
 0x65f   :  { %v1784_v48 = vld [vmem:[%s3730_s4 + $0x8] sm:$0xff] }
 0x660   :  { %v2934_v49 = vpop.eup %2933 }
 0x661   :  { %v1330_v50 = vmul.f32 %v2934_v49, %v1315_v58 }
 0x663   :  { %v1332_v54 = vsel %vm1331_vm14, %v1315_v58, %v1330_v50 }
 0x664   :  { %v2936_v55 = vpop.eup %2935  ;;  %v1335_v6 = vsel %vm1333_vm15, %v1334_v52, %v1332_v54  ;;  %v2221_v54 = vld [vmem:[%s3731_s20] ss:$0 sm:$0xff] }
 0x665   :  { %2673 = vmatmul.mubr.msk.f32.vlgmr.msra.gmra.mrb[50].mxu0 %vm447_vm6, %v1335_v6  ;;  %v1337_v7 = vmul.f32 %v2936_v55, %v1320_v53 }
 0x666   :  { %2675 = vmatprep.mubr.msk.f32.mxu0 %vm2952_vm0, %v2953_v4  ;;  %2861 = vmatpush3.bf16.msra.mxu0 %v2860_v20 }
 0x667   :  { %v1339_v9 = vsel %vm1338_vm1, %v1320_v53, %v1337_v7  ;;  %2700 = vmatprep.subr.mxu0 %v2953_v4 }
 0x668   :  { %v2938_v10 = vpop.eup %2937  ;;  %v1342_v11 = vsel %vm1340_vm2, %v1341_v8, %v1339_v9 }
 0x669   :  { %2676 = vmatmul.mubr.msk.f32.gmra.mrb[52].mxu0 %vm447_vm6, %v1342_v11  ;;  %v1344_v13 = vmul.f32 %v2938_v10, %v1325_v59 }
 0x66a   :  { %2678 = vmatprep.mubr.msk.f32.mxu0 %vm2952_vm0, %v2953_v4  ;;  %2701 = vmatpush3.msk.msra.mxu0 %vm457_vm4, %v1573_v21 }
 0x66b   :  { %v1346_v15 = vsel %vm1345_vm3, %v1325_v59, %v1344_v13  ;;  %2865 = vmatprep.subr.bf16.mxu0 %v2951_v0  ;;  %v1783_v59 = vld [vmem:[%s3730_s4] sm:$0xff] }
 0x66c   :  { %v1349_v17 = vsel %vm1347_vm5, %v1348_v14, %v1346_v15  ;;  %v2866_v49 = vpack.c.bf16 %v1784_v48, %v1783_v59 }
 0x66d   :  { %2679 = vmatmul.mubr.msk.f32.gmra.mrb[54].mxu0 %vm447_vm6, %v1349_v17 }
 0x66e   :  { %2702 = vmatprep.mubr.msk.f32.mxu0 %vm2952_vm0, %v2953_v4 }
 0x738   :  { %v1434_v22 = vpop.f32.mrb[50].mxu0 }
 0x739   :  { %v1527_v25 = vadd.f32 %v3509_v38, %v1434_v22  ;;  %v2674_v31 = vpop.f32.mrb[51].mxu0 }
 0x73b   :  { %v1547_v27 = vadd.f32 %v2217_v24, %v1527_v25 }
 0x73c   :  { %v1439_v28 = vpop.f32.mrb[52].mxu0 }
 0x73d   :  { %v2218_v29 = vmul.f32 -1.442695, %v1547_v27  ;;  %v1532_v30 = vadd.f32 %v3517_v39, %v1439_v28  ;;  %v2677_v35 = vpop.f32.mrb[53].mxu0 }
 0x73f   :  { %2939 = vpow2.f32 %v2218_v29  ;;  %v1548_v32 = vadd.f32 %v2217_v24, %v1532_v30 }
 0x740   :  { %v1444_v34 = vpop.f32.mrb[54].mxu0 }
 0x741   :  { %v2219_v36 = vmul.f32 -1.442695, %v1548_v32  ;;  %v1537_v0 = vadd.f32 %v3523_v41, %v1444_v34  ;;  %v2680_v37 = vpop.f32.mrb[55].mxu0 }
 0x743   :  { %2941 = vpow2.f32 %v2219_v36  ;;  %v1549_v42 = vadd.f32 %v2217_v24, %v1537_v0 }
 0x745   :  { %v2220_v40 = vmul.f32 -1.442695, %v1549_v42 }
 0x747   :  { %2943 = vpow2.f32 %v2220_v40 }
 0x749   :  { %v2940_v46 = vpop.eup %2939 }
 0x74a   :  { %v1559_v38 = vadd.f32 1.0, %v2940_v46 }
 0x74c   :  { %2945 = vrcp.f32 %v1559_v38 }
 0x74d   :  { %v2942_v57 = vpop.eup %2941 }
 0x74e   :  { %v1560_v61 = vadd.f32 1.0, %v2942_v57 }
 0x750   :  { %2947 = vrcp.f32 %v1560_v61 }
 0x751   :  { %v2944_v43 = vpop.eup %2943 }
 0x752   :  { %v1561_v39 = vadd.f32 1.0, %v2944_v43 }
 0x754   :  { %2949 = vrcp.f32 %v1561_v39 }
 0x756   :  { %v2946_v44 = vpop.eup %2945 }
 0x757   :  { %v1568_v58 = vmul.f32 %v2946_v44, %v1547_v27 }
 0x759   :  { %2703 = vmatmul.mubr.msk.f32.vlgmr.msra.gmra.mrb[56].mxu0 %vm447_vm6, %v1568_v58 }
 0x75a   :  { %v2948_v45 = vpop.eup %2947  ;;  %2705 = vmatprep.mubr.msk.f32.mxu0 %vm2952_vm0, %v2953_v4  ;;  %2867 = vmatpush3.bf16.msra.mxu0 %v2866_v49 }
 0x75b   :  { %v1569_v41 = vmul.f32 %v2948_v45, %v1548_v32  ;;  %2742 = vmatprep.subr.mxu0 %v2953_v4 }
 0x75d   :  { %2706 = vmatmul.mubr.msk.f32.gmra.mrb[58].mxu0 %vm447_vm6, %v1569_v41 }
 0x75e   :  { %v2950_v53 = vpop.eup %2949  ;;  %2708 = vmatprep.mubr.msk.f32.mxu0 %vm2952_vm0, %v2953_v4 }
 0x75f   :  { %v1570_v47 = vmul.f32 %v2950_v53, %v1549_v42 }
 0x761   :  { %2709 = vmatmul.mubr.msk.f32.gmra.mrb[60].mxu0 %vm447_vm6, %v1570_v47 }
 0x762   :  { %2744 = vmatprep.mubr.msk.f32.mxu0 %vm2952_vm0, %v2953_v4 }
 0x82c   :  { %v1659_v50 = vpop.f32.mrb[56].mxu0 }
 0x82d   :  { %v2704_v52 = vpop.f32.mrb[57].mxu0  ;;  %v1660_v6 = vadd.f32 %v2221_v54, %v1659_v50 }
 0x830   :  { %v1664_v55 = vpop.f32.mrb[58].mxu0 }
 0x831   :  { %v1665_v7 = vadd.f32 %v2221_v54, %v1664_v55  ;;  %v2707_v8 = vpop.f32.mrb[59].mxu0 }
 0x833   :  { %v2863_v9 = vpack.c.bf16 %v1665_v7, %v1660_v6 }
 0x834   :  { %v1669_v10 = vpop.f32.mrb[60].mxu0 }
 0x835   :  { %v2710_v11 = vpop.f32.mrb[61].mxu0  ;;  %2864 = vmatpush3.bf16.msra.mxu1 %v2863_v9  ;;  %v1670_v13 = vadd.f32 %v2221_v54, %v1669_v10 }
 0x836   :  { %2715 = vmatprep.subr.mxu1 %v2953_v4 }
 0x839   :  { %2716 = vmatpush3.msk.msra.mxu1 %vm895_vm12, %v1670_v13 }
 0x83a   :  { %2718 = vmatmul.mubr.msk.f32.vlgmr.msra.gmra.mrb[62].mxu1 %vm873_vm13, %v3334_v56  ;;  %v1785_v56 = vld [vmem:[%s3730_s4 + $0x10] sm:$0xf] }
 0x83b   :  { %2720 = vmatprep.mubr.msk.f32.mxu1 %vm2952_vm0, %v2953_v4  ;;  %2743 = vmatpush3.msk.msra.mxu0 %vm457_vm4, %v1785_v56  ;;  %vm2013_vm4 = vcmask 1044480  }
 0x83e   :  { %2721 = vmatmul.mubr.msk.f32.gmra.mrb[64].mxu1 %vm873_vm13, %v3345_v62 }
 0x83f   :  { %2723 = vmatprep.mubr.msk.f32.mxu1 %vm2952_vm0, %v2953_v4 }
 0x842   :  { %2724 = vmatmul.mubr.msk.f32.gmra.mrb[66].mxu1 %vm873_vm13, %v3355_v63 }
 0x843   :  { %2726 = vmatprep.mubr.msk.f32.mxu1 %vm2952_vm0, %v2953_v4 }
 0x846   :  { %2727 = vmatmul.mubr.msk.f32.gmra.mrb[68].mxu1 %vm873_vm13, %v3364_v1 }
 0x847   :  { %2729 = vmatprep.mubr.msk.f32.mxu1 %vm2952_vm0, %v2953_v4 }
 0x84a   :  { %2730 = vmatmul.mubr.msk.f32.gmra.mrb[70].mxu1 %vm873_vm13, %v3373_v2 }
 0x84b   :  { %2732 = vmatprep.mubr.msk.f32.mxu1 %vm2952_vm0, %v2953_v4 }
 0x84e   :  { %2733 = vmatmul.mubr.msk.f32.gmra.mrb[72].mxu1 %vm873_vm13, %v3382_v3 }
 0x84f   :  { %2735 = vmatprep.mubr.msk.f32.mxu1 %vm2952_vm0, %v2953_v4 }
 0x852   :  { %2736 = vmatmul.mubr.msk.f32.gmra.mrb[74].mxu1 %vm873_vm13, %v3391_v5 }
 0x90d   :  { %v1742_v62 = vpop.f32.mrb[62].mxu1 }
 0x90e   :  { %v1776_v63 = vmul.f32 %v1742_v62, %v3492_v51  ;;  %v2719_v1 = vpop.f32.mrb[63].mxu1 }
 0x910   :  { %2745 = vmatmul.mubr.msk.f32.vlgmr.msra.gmra.mrb[62].mxu0 %vm447_vm6, %v1776_v63  ;;  %2773 = vmatprep.mubr.msk.f32.mxu1 %vm447_vm6, %v1776_v63 }
 0x911   :  { %v1747_v2 = vpop.f32.mrb[64].mxu1  ;;  %2747 = vmatprep.mubr.msk.f32.mxu0 %vm2952_vm0, %v2953_v4 }
 0x912   :  { %v1777_v3 = vmul.f32 %v1747_v2, %v3494_v60  ;;  %v2722_v5 = vpop.f32.mrb[65].mxu1 }
 0x914   :  { %2748 = vmatmul.mubr.msk.f32.gmra.mrb[64].mxu0 %vm447_vm6, %v1777_v3 }
 0x915   :  { %v1752_v14 = vpop.f32.mrb[66].mxu1  ;;  %2750 = vmatprep.mubr.msk.f32.mxu0 %vm2952_vm0, %v2953_v4 }
 0x916   :  { %v1778_v51 = vmul.f32 %v1752_v14, %v3496_v12  ;;  %v2725_v15 = vpop.f32.mrb[67].mxu1 }
 0x918   :  { %2751 = vmatmul.mubr.msk.f32.gmra.mrb[66].mxu0 %vm447_vm6, %v1778_v51 }
 0x919   :  { %v1757_v17 = vpop.f32.mrb[68].mxu1  ;;  %2753 = vmatprep.mubr.msk.f32.mxu0 %vm2952_vm0, %v2953_v4 }
 0x91a   :  { %v1779_v18 = vmul.f32 %v1757_v17, %v3499_v16  ;;  %v2728_v19 = vpop.f32.mrb[69].mxu1 }
 0x91c   :  { %2754 = vmatmul.mubr.msk.f32.gmra.mrb[68].mxu0 %vm447_vm6, %v1779_v18 }
 0x91d   :  { %v1762_v60 = vpop.f32.mrb[70].mxu1  ;;  %2756 = vmatprep.mubr.msk.f32.mxu0 %vm2952_vm0, %v2953_v4 }
 0x91e   :  { %v1780_v20 = vmul.f32 %v1762_v60, %v3501_v23  ;;  %v2731_v21 = vpop.f32.mrb[71].mxu1  ;;  %v2014_v23 = vrot.slane %v1779_v18, 3 }
 0x920   :  { %2757 = vmatmul.mubr.msk.f32.gmra.mrb[70].mxu0 %vm447_vm6, %v1780_v20  ;;  %v2015_v16 = vrot.slane %v1780_v20, 3 }
 0x921   :  { %v1767_v12 = vpop.f32.mrb[72].mxu1  ;;  %2759 = vmatprep.mubr.msk.f32.mxu0 %vm2952_vm0, %v2953_v4 }
 0x922   :  { %v1781_v22 = vmul.f32 %v1767_v12, %v3504_v26  ;;  %v2734_v24 = vpop.f32.mrb[73].mxu1  ;;  %v2016_v26 = vsel %vm2013_vm4, %v2014_v23, %v2015_v16 }
 0x924   :  { %v2017_v25 = vrot.slane %v1781_v22, 3  ;;  %2760 = vmatmul.mubr.msk.f32.gmra.mrb[72].mxu0 %vm447_vm6, %v1781_v22 }
 0x925   :  { %v1772_v31 = vpop.f32.mrb[74].mxu1  ;;  %2762 = vmatprep.mubr.msk.f32.mxu0 %vm2952_vm0, %v2953_v4  ;;  %vm3652_vm0 = vmpackc.low %vm447_vm6, %vm447_vm6 }
 0x926   :  { %v2018_v27 = vsel %vm2013_vm4, %v2015_v16, %v2017_v25  ;;  %v1782_v28 = vmul.f32 %v1772_v31, %v3506_v33  ;;  %v2737_v29 = vpop.f32.mrb[75].mxu1 }
 0x928   :  { %v2019_v30 = vrot.slane %v1782_v28, 3  ;;  %2763 = vmatmul.mubr.msk.f32.gmra.mrb[74].mxu0 %vm447_vm6, %v1782_v28 }
 0x929   :  { %2787 = vmatprep.mubr.msk.f32.mxu0 %vm447_vm6, %v2016_v26 }
 0x92a   :  { %v2020_v35 = vsel %vm2013_vm4, %v2017_v25, %v2019_v30 }
 0x9e3   :  { %v1876_v32 = vpop.f32.mrb[62].mxu0 }
 0x9e4   :  { %v2746_v34 = vpop.f32.mrb[63].mxu0 }
 0x9e7   :  { %v1881_v36 = vpop.f32.mrb[64].mxu0 }
 0x9e8   :  { %v2868_v33 = vpack.c.bf16 %v1881_v36, %v1876_v32  ;;  %v2749_v0 = vpop.f32.mrb[65].mxu0 }
 0x9ea   :  { %2870 = vmatprep.subr.msk.bf16.mxu1 %vm3652_vm0, %v2868_v33 }
 0x9eb   :  { %v1886_v37 = vpop.f32.mrb[66].mxu0  ;;  %2873 = vmatpush3.bf16.xpose.msk.msra.mxu1 %vm3652_vm0, %v2868_v33 }
 0x9ec   :  { %v2752_v42 = vpop.f32.mrb[67].mxu0 }
 0x9ef   :  { %v1891_v40 = vpop.f32.mrb[68].mxu0 }
 0x9f0   :  { %v2874_v46 = vpack.c.bf16 %v1891_v40, %v1886_v37  ;;  %v2755_v38 = vpop.f32.mrb[69].mxu0  ;;  %v2024_v61 = vrot.slane %v1891_v40, 3 }
 0x9f2   :  { %2876 = vmatprep.subr.msk.bf16.mxu1 %vm3652_vm0, %v2874_v46 }
 0x9f3   :  { %v1896_v57 = vpop.f32.mrb[70].mxu0  ;;  %2879 = vmatpush3.bf16.xpose.msk.msra.mxu1 %vm3652_vm0, %v2874_v46 }
 0x9f4   :  { %v2025_v43 = vrot.slane %v1896_v57, 3  ;;  %v2758_v39 = vpop.f32.mrb[71].mxu0 }
 0x9f6   :  { %v2026_v44 = vsel %vm2013_vm4, %v2024_v61, %v2025_v43 }
 0x9f7   :  { %v1901_v58 = vpop.f32.mrb[72].mxu0 }
 0x9f8   :  { %v2027_v45 = vrot.slane %v1901_v58, 3  ;;  %v2761_v41 = vpop.f32.mrb[73].mxu0 }
 0x9fa   :  { %v2028_v53 = vsel %vm2013_vm4, %v2025_v43, %v2027_v45  ;;  %2774 = vmatmul.mubr.msk.f32.vlgmr.msra.gmra.mrb[76].mxu1 %vm447_vm6, %v1777_v3 }
 0x9fb   :  { %v2880_v47 = vpack.c.bf16 %v2028_v53, %v2026_v44  ;;  %v1906_v59 = vpop.f32.mrb[74].mxu0  ;;  %2776 = vmatprep.mubr.msk.f32.mxu1 %vm447_vm6, %v1778_v51 }
 0x9fc   :  { %v2029_v48 = vrot.slane %v1906_v59, 3  ;;  %v2764_v49 = vpop.f32.mrb[75].mxu0 }
 0x9fd   :  { %2882 = vmatprep.subr.msk.bf16.mxu0 %vm3652_vm0, %v2880_v47 }
 0x9fe   :  { %v2030_v50 = vsel %vm2013_vm4, %v2027_v45, %v2029_v48  ;;  %2777 = vmatmul.mubr.msk.f32.gmra.mrb[78].mxu1 %vm447_vm6, %v1779_v18  ;;  %2885 = vmatpush3.bf16.xpose.msk.msra.mxu0 %vm3652_vm0, %v2880_v47 }
 0x9ff   :  { %v2886_v52 = vpack.c.bf16 %v2029_v48, %v2030_v50 }
 0xa01   :  { %2888 = vmatprep.subr.msk.bf16.mxu0 %vm3652_vm0, %v2886_v52 }
 0xa06   :  { %2891 = vmatpush3.bf16.xpose.msk.msra.mxu0 %vm3652_vm0, %v2886_v52 }
 0xa0d   :  { %2788 = vmatmul.mubr.msk.f32.vlgmr.msra.gmra.mrb[76].mxu0 %vm447_vm6, %v2018_v27 }
 0xa0e   :  { %2790 = vmatprep.mubr.msk.f32.mxu0 %vm447_vm6, %v2020_v35 }
 0xa11   :  { %2791 = vmatmul.mubr.msk.f32.gmra.mrb[78].mxu0 %vm447_vm6, %v2019_v30 }
 0xacd   :  { %v2775_v54 = vpop.f32.mrb[76].mxu1 }
 0xace   :  { %2009 = vst.msk [vmem:[%s3732_s21 + $0x8] sm:$0xff] %vm2007_vm7, %v2775_v54  ;;  %v1988_v55 = vpop.f32.mrb[77].mxu1 }
 0xacf   :  { %2008 = vst.msk [vmem:[%s3732_s21] sm:$0xff] %vm2007_vm7, %v1988_v55 }
 0xad1   :  { %v2778_v6 = vpop.f32.mrb[78].mxu1 }
 0xad2   :  { %2012 = vst.msk [vmem:[%s3732_s21 + $0x18] sm:$0x7] %vm2011_vm8, %v2778_v6  ;;  %v1998_v7 = vpop.f32.mrb[79].mxu1 }
 0xad3   :  { %2010 = vst.msk [vmem:[%s3732_s21 + $0x10] sm:$0xff] %vm2007_vm7, %v1998_v7 }
 0xae0   :  { %v2789_v8 = vpop.f32.mrb[76].mxu0 }
 0xae1   :  { %2259 = vst.msk [vmem:[%s3732_s21 + $0x28] sm:$0xff] %vm2007_vm7, %v2789_v8  ;;  %v2113_v9 = vpop.f32.mrb[77].mxu0 }
 0xae2   :  { %2258 = vst.msk [vmem:[%s3732_s21 + $0x20] sm:$0xff] %vm2007_vm7, %v2113_v9 }
 0xae4   :  { %v2792_v10 = vpop.f32.mrb[78].mxu0 }
 0xae5   :  { %2261 = vst.msk [vmem:[%s3732_s21 + $0x38] sm:$0x7] %vm2011_vm8, %v2792_v10  ;;  %v2123_v11 = vpop.f32.mrb[79].mxu0 }
 0xae6   :  { %2260 = vst.msk [vmem:[%s3732_s21 + $0x30] sm:$0xff] %vm2007_vm7, %v2123_v11 }

</bundles_post_ra>
